<compile_context>
chip_gen: v6e
topology: v6e:2x2x1
jax: 0.10.0
libtpu: 0.0.40
codegen_flags: <defaults>
</compile_context>

<pallas_src>
from functools import partial

import numpy as np

import jax
import jax.numpy as jnp
from jax.experimental import pallas as pl
from jax.experimental.pallas import tpu as pltpu

MXU_DTYPE = jnp.bfloat16   # MXU operand dtype (accumulation stays f32)
LANE = 128                 # TPU lane width
SUBLANE_BF16 = 16          # bf16 sublane packing
BN_EPS = 1e-5


# ----------------------------------------------------------------------------
# Connectivity maps (pure numpy, weights-only preprocessing)
# ----------------------------------------------------------------------------
def _convT_pos_maps(h_in, w_in, k=3, s=2, p=1, op=1):
    """0/1 connectivity maps for ConvTranspose2d(k,s,p,op): maps[ky,kx,p_in,p_out]."""
    h_out = (h_in - 1) * s - 2 * p + k + op
    w_out = (w_in - 1) * s - 2 * p + k + op
    maps = np.zeros((k, k, h_in * w_in, h_out * w_out), np.float32)
    for ky in range(k):
        for kx in range(k):
            for iy in range(h_in):
                oy = iy * s - p + ky
                if not 0 <= oy < h_out:
                    continue
                for ix in range(w_in):
                    ox = ix * s - p + kx
                    if 0 <= ox < w_out:
                        maps[ky, kx, iy * w_in + ix, oy * w_out + ox] = 1.0
    return maps, h_out, w_out


def _conv_pos_maps(h, w, k=3, p=1):
    """0/1 connectivity maps for Conv2d(k, stride=1, padding=p)."""
    maps = np.zeros((k, k, h * w, h * w), np.float32)
    for ky in range(k):
        for kx in range(k):
            for oy in range(h):
                iy = oy + ky - p
                if not 0 <= iy < h:
                    continue
                for ox in range(w):
                    ix = ox + kx - p
                    if 0 <= ix < w:
                        maps[ky, kx, iy * w + ix, oy * w + ox] = 1.0
    return maps


# ----------------------------------------------------------------------------
# Parameter preprocessing (weights only; activations never leave the kernel)
# ----------------------------------------------------------------------------
def _prepare_operands(params, cd):
    """Turn every layer into GEMM operands on flattened NCHW maps
    (column index = c*H*W + y*W + x) and pack small params into slabs."""
    n_blocks = len(cd)
    lin_wT = jnp.transpose(params["lin_w"]).astype(jnp.float32)   # (hidden, C0*4)
    lin_b = params["lin_b"].astype(jnp.float32)                   # (C0*4,)

    wslabs, pools = [], []
    block_meta = []          # (k_rows, c_out, hw, n_cols)
    f32_rows = []            # packed later into one lane-dense slab
    h = 2
    for i in range(n_blocks):
        if i < n_blocks - 1:
            w, b = params[f"dec{i}_w"], params[f"dec{i}_b"]
            g, beta = params[f"dec{i}_gamma"], params[f"dec{i}_beta"]
        else:  # final_layer's ConvTranspose2d + BatchNorm
            w, b = params["fin_ct_w"], params["fin_ct_b"]
            g, beta = params["fin_gamma"], params["fin_beta"]
        c_in, c_out = int(w.shape[0]), int(w.shape[1])            # PyTorch (Cin,Cout,3,3)
        maps, h_out, w_out = _convT_pos_maps(h, h)
        hw = h_out * w_out
        n_cols = c_out * hw
        op = jnp.einsum("cdyx,yxpq->cpdq", w.astype(jnp.float32), jnp.asarray(maps))
        op = op.reshape(c_in * h * h, n_cols)                     # (Cin*hw_in, Cout*hw_out)
        bias_row = jnp.repeat(b.astype(jnp.float32), hw)          # (n_cols,)
        if i == 0:
            # Fold the Linear layer into the first ConvT operator (exact algebra,
            # done in f32 before the single bf16 rounding of the combined operator).
            bias_row = bias_row + lin_b @ op
            op = lin_wT @ op                                      # (hidden, n_cols)
        k_rows = int(op.shape[0])

        poolT = np.kron(np.eye(c_out, dtype=np.float32),
                        np.ones((1, hw), np.float32))             # (c_out, n_cols) 0/1
        pool = poolT.T                                            # (n_cols, c_out) 0/1

        # Per-block bf16 slab: [operator ; channel-broadcast matrix].
        wslab = jnp.concatenate(
            [op.astype(MXU_DTYPE), jnp.asarray(poolT).astype(MXU_DTYPE)], axis=0)
        pad_r = (-int(wslab.shape[0])) % SUBLANE_BF16
        if pad_r:
            wslab = jnp.pad(wslab, ((0, pad_r), (0, 0)))
        wslabs.append(wslab)
        pools.append(jnp.asarray(pool).astype(MXU_DTYPE))
        block_meta.append((k_rows, c_out, hw, n_cols))

        f32_rows.append(bias_row)                    # slab row 3*i
        f32_rows.append(g.astype(jnp.float32))       # slab row 3*i + 1
        f32_rows.append(beta.astype(jnp.float32))    # slab row 3*i + 2
        h = h_out

    # Final Conv2d(cd[-1] -> 1, k=3, pad=1); output padded to 128 lanes.
    wc, bc = params["fin_conv_w"], params["fin_conv_b"]           # (1, Cin, 3, 3)
    c_in = int(wc.shape[1])
    hw = h * h
    maps = _conv_pos_maps(h, h)
    op_fc = jnp.einsum("dcyx,yxpq->cpdq", wc.astype(jnp.float32),
                       jnp.asarray(maps)).reshape(c_in * hw, hw)
    n_pad = -(-hw // LANE) * LANE
    op_fc = jnp.pad(op_fc, ((0, 0), (0, n_pad - hw))).astype(MXU_DTYPE)
    bfc_row = jnp.pad(jnp.repeat(bc.astype(jnp.float32), hw), (0, n_pad - hw))
    f32_rows.append(bfc_row)                          # slab row 3*n_blocks

    # Pack every small f32 vector into ONE lane-dense slab (one DMA).
    width = -(-max(int(r.shape[0]) for r in f32_rows) // LANE) * LANE
    slab_rows = -(-len(f32_rows) // 8) * 8
    fslab = jnp.zeros((slab_rows, width), jnp.float32)
    for r, vec in enumerate(f32_rows):
        fslab = fslab.at[r, : int(vec.shape[0])].set(vec)

    return fslab, wslabs, pools, op_fc, tuple(block_meta), h, hw, n_pad


# ----------------------------------------------------------------------------
# The single fused Pallas kernel
# ----------------------------------------------------------------------------
def _make_decoder_kernel(block_meta, fin_bias_row, n_pad, batch, b_pad, eps=BN_EPS):
    n_blocks = len(block_meta)

    def kernel(x_ref, fslab_ref, *refs):
        o_ref = refs[-1]
        wrefs = refs[:-1]

        # 0/1 validity column: zero out the padded batch rows so BatchNorm batch
        # statistics only see the real `batch` rows (padded rows would otherwise
        # pick up the bias after each GEMM).
        valid = (jax.lax.broadcasted_iota(jnp.int32, (b_pad, 1), 0)
                 < batch).astype(jnp.float32)

        a16 = x_ref[...]                               # (b_pad, hidden) bf16
        for i in range(n_blocks):
            k_rows, c_out, hw, n_cols = block_meta[i]
            wslab_ref = wrefs[2 * i]
            pool_ref = wrefs[2 * i + 1]
            bias = fslab_ref[3 * i:3 * i + 1, 0:n_cols]
            gamma = fslab_ref[3 * i + 1:3 * i + 2, 0:c_out]
            beta = fslab_ref[3 * i + 2:3 * i + 3, 0:c_out]
            op = wslab_ref[0:k_rows, :]                        # ConvT operator (bf16)
            poolT = wslab_ref[k_rows:k_rows + c_out, :]        # channel broadcast (bf16)

            # ConvTranspose2d as one lane-dense GEMM (bf16 operands, f32 accum).
            z = jnp.dot(a16, op, preferred_element_type=jnp.float32) + bias
            z = z * valid                                       # padding-safe stats

            # Fused BatchNorm (training-mode batch stats) + ReLU epilogue.
            # Exact f32 reduction over the batch/sublane axis first, then one tiny
            # bf16 matmul per direction (no f32 MXU operands -> v7x friendly).
            inv_n = 1.0 / float(batch * hw)
            s1 = jnp.sum(z, axis=0, keepdims=True)              # (1, n_cols) f32
            s2 = jnp.sum(z * z, axis=0, keepdims=True)          # (1, n_cols) f32
            s12 = jnp.concatenate([s1, s2], axis=0)             # (2, n_cols)
            pooled = jnp.dot(s12.astype(MXU_DTYPE), pool_ref[...],
                             preferred_element_type=jnp.float32)  # (2, c_out)
            mean = pooled[0:1, :] * inv_n
            ex2 = pooled[1:2, :] * inv_n
            var = jnp.maximum(ex2 - mean * mean, 0.0)
            scale_c = gamma * jax.lax.rsqrt(var + eps)          # (1, c_out)
            shift_c = beta - mean * scale_c
            ss = jnp.concatenate([scale_c, shift_c], axis=0)    # (2, c_out)
            ssb = jnp.dot(ss.astype(MXU_DTYPE), poolT,
                          preferred_element_type=jnp.float32)   # (2, n_cols)
            a = jnp.maximum(z * ssb[0:1, :] + ssb[1:2, :], 0.0)  # BN + ReLU
            a16 = a.astype(MXU_DTYPE)

        # Final Conv2d (Cout=1, padded to 128 output lanes) + Tanh.
        op_fc_ref = wrefs[2 * n_blocks]
        bfc = fslab_ref[fin_bias_row:fin_bias_row + 1, 0:n_pad]
        z = jnp.dot(a16, op_fc_ref[...], preferred_element_type=jnp.float32) + bfc
        o_ref[...] = jnp.tanh(z)

    return kernel


@partial(jax.jit, static_argnums=(2,))
def decoder_forward(x, params, conv_dims_reversed):
    """x: (B, hidden_dim) -> (B, 1, H, H) NCHW, matching the PyTorch Decoder."""
    cd = tuple(conv_dims_reversed)
    batch = int(x.shape[0])
    b_pad = max(SUBLANE_BF16, -(-batch // SUBLANE_BF16) * SUBLANE_BF16)

    (fslab, wslabs, pools, op_fc, block_meta,
     h_final, n_valid, n_pad) = _prepare_operands(params, cd)

    # Sublane-dense, bf16 MXU-ready input (padded rows are zero).
    x_pad = jnp.zeros((b_pad, x.shape[1]), MXU_DTYPE)
    x_pad = x_pad.at[:batch, :].set(x.astype(MXU_DTYPE))

    inputs = [x_pad, fslab]
    for ws, pm in zip(wslabs, pools):
        inputs += [ws, pm]
    inputs.append(op_fc)

    kernel = _make_decoder_kernel(block_meta, 3 * len(cd), n_pad, batch, b_pad)

    out2d = pl.pallas_call(
        kernel,
        out_shape=jax.ShapeDtypeStruct((b_pad, n_pad), jnp.float32),
        in_specs=[pl.BlockSpec(memory_space=pltpu.MemorySpace.VMEM)
                  for _ in inputs],
        out_specs=pl.BlockSpec(memory_space=pltpu.MemorySpace.VMEM),
    )(*inputs)

    # Drop batch/lane padding and restore NCHW.
    return out2d[:batch, :n_valid].reshape(batch, 1, h_final, h_final)


# ----------------------------------------------------------------------------
# Deterministic synthetic parameters (PyTorch-native layouts)
# ----------------------------------------------------------------------------
def init_decoder_params(key, hidden_dim, conv_dims_reversed):
    cd = conv_dims_reversed
    params = {}
    keys = iter(jax.random.split(key, 64))

    def nrm(shape, scale=0.1):
        return (scale * jax.random.normal(next(keys), shape)).astype(jnp.float32)

    params["lin_w"] = nrm((cd[0] * 4, hidden_dim))            # nn.Linear: (out, in)
    params["lin_b"] = nrm((cd[0] * 4,))
    for i in range(len(cd) - 1):
        params[f"dec{i}_w"] = nrm((cd[i], cd[i + 1], 3, 3))   # ConvT: (Cin, Cout, 3, 3)
        params[f"dec{i}_b"] = nrm((cd[i + 1],))
        params[f"dec{i}_gamma"] = jnp.ones((cd[i + 1],), jnp.float32)
        params[f"dec{i}_beta"] = jnp.zeros((cd[i + 1],), jnp.float32)
    params["fin_ct_w"] = nrm((cd[-1], cd[-1], 3, 3))
    params["fin_ct_b"] = nrm((cd[-1],))
    params["fin_gamma"] = jnp.ones((cd[-1],), jnp.float32)
    params["fin_beta"] = jnp.zeros((cd[-1],), jnp.float32)
    params["fin_conv_w"] = nrm((1, cd[-1], 3, 3))             # Conv2d: (Cout, Cin, 3, 3)
    params["fin_conv_b"] = nrm((1,))
    return params


# ----------------------------------------------------------------------------
# Pure-JAX (lax) reference of the same module, used only for validation
# ----------------------------------------------------------------------------
def reference_forward(x, params, cd):
    B = x.shape[0]
    y = x @ params["lin_w"].T + params["lin_b"]
    y = y.reshape(B, cd[0], 2, 2)

    def conv_t(h, w, b):  # ConvTranspose2d(k=3, s=2, p=1, op=1)
        wf = jnp.flip(w, (2, 3)).transpose(1, 0, 2, 3)
        out = jax.lax.conv_general_dilated(
            h, wf, window_strides=(1, 1), padding=((1, 2), (1, 2)),
            lhs_dilation=(2, 2), dimension_numbers=("NCHW", "OIHW", "NCHW"))
        return out + b.reshape(1, -1, 1, 1)

    def bn_relu(h, g, bt, eps=BN_EPS):
        m = h.mean(axis=(0, 2, 3), keepdims=True)
        v = ((h - m) ** 2).mean(axis=(0, 2, 3), keepdims=True)
        hn = (h - m) * jax.lax.rsqrt(v + eps)
        return jnp.maximum(hn * g.reshape(1, -1, 1, 1) + bt.reshape(1, -1, 1, 1), 0.0)

    for i in range(len(cd) - 1):
        y = bn_relu(conv_t(y, params[f"dec{i}_w"], params[f"dec{i}_b"]),
                    params[f"dec{i}_gamma"], params[f"dec{i}_beta"])
    y = bn_relu(conv_t(y, params["fin_ct_w"], params["fin_ct_b"]),
                params["fin_gamma"], params["fin_beta"])
    out = jax.lax.conv_general_dilated(
        y, params["fin_conv_w"], (1, 1), ((1, 1), (1, 1)),
        dimension_numbers=("NCHW", "OIHW", "NCHW"))
    out = out + params["fin_conv_b"].reshape(1, -1, 1, 1)
    return jnp.tanh(out)


# ----------------------------------------------------------------------------
if __name__ == "__main__":
    hidden_dim = 32
    conv_dims = [16, 32]
    conv_dims = conv_dims[::-1]     # the module reverses conv_dims in __init__ -> [32, 16]
    batch = 2

    key = jax.random.PRNGKey(0)
    k_in, k_par = jax.random.split(key)
    x = jax.random.normal(k_in, (batch, hidden_dim), dtype=jnp.float32)
    params = init_decoder_params(k_par, hidden_dim, conv_dims)

    out = decoder_forward(x, params, tuple(conv_dims))
    out = jax.block_until_ready(out)

    side = 2 * (2 ** len(conv_dims))            # 2 -> 4 -> 8
    assert out.shape == (batch, 1, side, side), out.shape
    assert bool(jnp.all(jnp.isfinite(out)))
    assert bool(jnp.all(jnp.abs(out) <= 1.0 + 1e-6))   # tanh range

    # Validate against a pure-JAX reference (loose tolerance: bf16 MXU operands).
    ref = reference_forward(x, params, tuple(conv_dims))
    err = float(jnp.max(jnp.abs(out - ref)))
    assert err < 0.15, f"mismatch vs reference: max |diff| = {err}"

    print("KERNEL_OK")
</pallas_src>

<mosaic_0001>
module attributes {stable_mosaic.version = 11 : i64} {
  func.func @kernel(%arg0: memref<16x32xbf16, #tpu.memory_space<vmem>>, %arg1: memref<8x1024xf32, #tpu.memory_space<vmem>>, %arg2: memref<48x256xbf16, #tpu.memory_space<vmem>>, %arg3: memref<256x16xbf16, #tpu.memory_space<vmem>>, %arg4: memref<272x1024xbf16, #tpu.memory_space<vmem>>, %arg5: memref<1024x16xbf16, #tpu.memory_space<vmem>>, %arg6: memref<1024x128xbf16, #tpu.memory_space<vmem>>, %arg7: memref<16x128xf32, #tpu.memory_space<vmem>>) attributes {dimension_semantics = [], scalar_prefetch = 0 : i64, scratch_operands = 0 : i64, tpu.core_type = #tpu.core_type<tc>} {
    %0 = tpu.iota {dimensions = array<i32: 0>} : vector<16x1xi32>
    %c2_i32 = arith.constant 2 : i32
    %1 = vector.broadcast %c2_i32 : i32 to vector<16x1xi32>
    %2 = arith.cmpi slt, %0, %1 : vector<16x1xi32>
    %3 = arith.extui %2 : vector<16x1xi1> to vector<16x1xi32>
    %4 = arith.sitofp %3 : vector<16x1xi32> to vector<16x1xf32>
    %c0 = arith.constant 0 : index
    %c0_0 = arith.constant 0 : index
    %5 = vector.load %arg0[%c0, %c0_0] : memref<16x32xbf16, #tpu.memory_space<vmem>>, vector<16x32xbf16>
    %c0_1 = arith.constant 0 : index
    %c0_2 = arith.constant 0 : index
    %6 = vector.load %arg1[%c0_1, %c0_2] : memref<8x1024xf32, #tpu.memory_space<vmem>>, vector<1x256xf32>
    %c1 = arith.constant 1 : index
    %c0_3 = arith.constant 0 : index
    %7 = vector.load %arg1[%c1, %c0_3] : memref<8x1024xf32, #tpu.memory_space<vmem>>, vector<1x16xf32>
    %c2 = arith.constant 2 : index
    %c0_4 = arith.constant 0 : index
    %8 = vector.load %arg1[%c2, %c0_4] : memref<8x1024xf32, #tpu.memory_space<vmem>>, vector<1x16xf32>
    %c0_5 = arith.constant 0 : index
    %c0_6 = arith.constant 0 : index
    %9 = vector.load %arg2[%c0_5, %c0_6] : memref<48x256xbf16, #tpu.memory_space<vmem>>, vector<32x256xbf16>
    %c32 = arith.constant 32 : index
    %c0_7 = arith.constant 0 : index
    %10 = vector.load %arg2[%c32, %c0_7] : memref<48x256xbf16, #tpu.memory_space<vmem>>, vector<16x256xbf16>
    %cst = arith.constant dense<0.000000e+00> : vector<16x256xf32>
    %11 = tpu.matmul %5, %9, %cst {dimension_numbers = #tpu.dot_dimension_numbers<[1], [0], [0], [1], [0, 0, 1, 1], [], []>} : vector<16x32xbf16>, vector<32x256xbf16>, vector<16x256xf32> -> vector<16x256xf32>
    %12 = vector.broadcast %6 : vector<1x256xf32> to vector<16x256xf32>
    %13 = arith.addf %11, %12 : vector<16x256xf32>
    %14 = vector.broadcast %4 : vector<16x1xf32> to vector<16x256xf32>
    %15 = arith.mulf %13, %14 : vector<16x256xf32>
    %cst_8 = arith.constant dense<0.000000e+00> : vector<256xf32>
    %16 = vector.multi_reduction <add>, %15, %cst_8 [0] : vector<16x256xf32> to vector<256xf32>
    %17 = vector.shape_cast %16 : vector<256xf32> to vector<1x256xf32>
    %18 = arith.mulf %15, %15 : vector<16x256xf32>
    %cst_9 = arith.constant dense<0.000000e+00> : vector<256xf32>
    %19 = vector.multi_reduction <add>, %18, %cst_9 [0] : vector<16x256xf32> to vector<256xf32>
    %20 = vector.shape_cast %19 : vector<256xf32> to vector<1x256xf32>
    %21 = tpu.concatenate %17, %20 in 0 : vector<1x256xf32>, vector<1x256xf32> -> vector<2x256xf32>
    %22 = arith.truncf %21 : vector<2x256xf32> to vector<2x256xbf16>
    %c0_10 = arith.constant 0 : index
    %c0_11 = arith.constant 0 : index
    %23 = vector.load %arg3[%c0_10, %c0_11] : memref<256x16xbf16, #tpu.memory_space<vmem>>, vector<256x16xbf16>
    %cst_12 = arith.constant dense<0.000000e+00> : vector<2x16xf32>
    %24 = tpu.matmul %22, %23, %cst_12 {dimension_numbers = #tpu.dot_dimension_numbers<[1], [0], [0], [1], [0, 0, 1, 1], [], []>} : vector<2x256xbf16>, vector<256x16xbf16>, vector<2x16xf32> -> vector<2x16xf32>
    %25 = vector.extract_strided_slice %24 {offsets = [0, 0], sizes = [1, 16], strides = [1, 1]} : vector<2x16xf32> to vector<1x16xf32>
    %cst_13 = arith.constant 3.125000e-02 : f32
    %26 = vector.broadcast %cst_13 : f32 to vector<1x16xf32>
    %27 = arith.mulf %25, %26 : vector<1x16xf32>
    %28 = vector.extract_strided_slice %24 {offsets = [1, 0], sizes = [1, 16], strides = [1, 1]} : vector<2x16xf32> to vector<1x16xf32>
    %cst_14 = arith.constant 3.125000e-02 : f32
    %29 = vector.broadcast %cst_14 : f32 to vector<1x16xf32>
    %30 = arith.mulf %28, %29 : vector<1x16xf32>
    %31 = arith.mulf %27, %27 : vector<1x16xf32>
    %32 = arith.subf %30, %31 : vector<1x16xf32>
    %cst_15 = arith.constant 0.000000e+00 : f32
    %33 = vector.broadcast %cst_15 : f32 to vector<1x16xf32>
    %34 = arith.maximumf %32, %33 : vector<1x16xf32>
    %cst_16 = arith.constant 9.99999974E-6 : f32
    %35 = vector.broadcast %cst_16 : f32 to vector<1x16xf32>
    %36 = arith.addf %34, %35 : vector<1x16xf32>
    %37 = math.rsqrt %36 : vector<1x16xf32>
    %38 = arith.mulf %7, %37 : vector<1x16xf32>
    %39 = arith.mulf %27, %38 : vector<1x16xf32>
    %40 = arith.subf %8, %39 : vector<1x16xf32>
    %41 = tpu.concatenate %38, %40 in 0 : vector<1x16xf32>, vector<1x16xf32> -> vector<2x16xf32>
    %42 = arith.truncf %41 : vector<2x16xf32> to vector<2x16xbf16>
    %cst_17 = arith.constant dense<0.000000e+00> : vector<2x256xf32>
    %43 = tpu.matmul %42, %10, %cst_17 {dimension_numbers = #tpu.dot_dimension_numbers<[1], [0], [0], [1], [0, 0, 1, 1], [], []>} : vector<2x16xbf16>, vector<16x256xbf16>, vector<2x256xf32> -> vector<2x256xf32>
    %44 = vector.extract_strided_slice %43 {offsets = [0, 0], sizes = [1, 256], strides = [1, 1]} : vector<2x256xf32> to vector<1x256xf32>
    %45 = vector.broadcast %44 : vector<1x256xf32> to vector<16x256xf32>
    %46 = arith.mulf %15, %45 : vector<16x256xf32>
    %47 = vector.extract_strided_slice %43 {offsets = [1, 0], sizes = [1, 256], strides = [1, 1]} : vector<2x256xf32> to vector<1x256xf32>
    %48 = vector.broadcast %47 : vector<1x256xf32> to vector<16x256xf32>
    %49 = arith.addf %46, %48 : vector<16x256xf32>
    %cst_18 = arith.constant 0.000000e+00 : f32
    %50 = vector.broadcast %cst_18 : f32 to vector<16x256xf32>
    %51 = arith.maximumf %49, %50 : vector<16x256xf32>
    %52 = arith.truncf %51 : vector<16x256xf32> to vector<16x256xbf16>
    %c3 = arith.constant 3 : index
    %c0_19 = arith.constant 0 : index
    %53 = vector.load %arg1[%c3, %c0_19] : memref<8x1024xf32, #tpu.memory_space<vmem>>, vector<1x1024xf32>
    %c4 = arith.constant 4 : index
    %c0_20 = arith.constant 0 : index
    %54 = vector.load %arg1[%c4, %c0_20] : memref<8x1024xf32, #tpu.memory_space<vmem>>, vector<1x16xf32>
    %c5 = arith.constant 5 : index
    %c0_21 = arith.constant 0 : index
    %55 = vector.load %arg1[%c5, %c0_21] : memref<8x1024xf32, #tpu.memory_space<vmem>>, vector<1x16xf32>
    %c0_22 = arith.constant 0 : index
    %c0_23 = arith.constant 0 : index
    %56 = vector.load %arg4[%c0_22, %c0_23] : memref<272x1024xbf16, #tpu.memory_space<vmem>>, vector<256x1024xbf16>
    %c256 = arith.constant 256 : index
    %c0_24 = arith.constant 0 : index
    %57 = vector.load %arg4[%c256, %c0_24] : memref<272x1024xbf16, #tpu.memory_space<vmem>>, vector<16x1024xbf16>
    %cst_25 = arith.constant dense<0.000000e+00> : vector<16x1024xf32>
    %58 = tpu.matmul %52, %56, %cst_25 {dimension_numbers = #tpu.dot_dimension_numbers<[1], [0], [0], [1], [0, 0, 1, 1], [], []>} : vector<16x256xbf16>, vector<256x1024xbf16>, vector<16x1024xf32> -> vector<16x1024xf32>
    %59 = vector.broadcast %53 : vector<1x1024xf32> to vector<16x1024xf32>
    %60 = arith.addf %58, %59 : vector<16x1024xf32>
    %61 = vector.broadcast %4 : vector<16x1xf32> to vector<16x1024xf32>
    %62 = arith.mulf %60, %61 : vector<16x1024xf32>
    %cst_26 = arith.constant dense<0.000000e+00> : vector<1024xf32>
    %63 = vector.multi_reduction <add>, %62, %cst_26 [0] : vector<16x1024xf32> to vector<1024xf32>
    %64 = vector.shape_cast %63 : vector<1024xf32> to vector<1x1024xf32>
    %65 = arith.mulf %62, %62 : vector<16x1024xf32>
    %cst_27 = arith.constant dense<0.000000e+00> : vector<1024xf32>
    %66 = vector.multi_reduction <add>, %65, %cst_27 [0] : vector<16x1024xf32> to vector<1024xf32>
    %67 = vector.shape_cast %66 : vector<1024xf32> to vector<1x1024xf32>
    %68 = tpu.concatenate %64, %67 in 0 : vector<1x1024xf32>, vector<1x1024xf32> -> vector<2x1024xf32>
    %69 = arith.truncf %68 : vector<2x1024xf32> to vector<2x1024xbf16>
    %c0_28 = arith.constant 0 : index
    %c0_29 = arith.constant 0 : index
    %70 = vector.load %arg5[%c0_28, %c0_29] : memref<1024x16xbf16, #tpu.memory_space<vmem>>, vector<1024x16xbf16>
    %cst_30 = arith.constant dense<0.000000e+00> : vector<2x16xf32>
    %71 = tpu.matmul %69, %70, %cst_30 {dimension_numbers = #tpu.dot_dimension_numbers<[1], [0], [0], [1], [0, 0, 1, 1], [], []>} : vector<2x1024xbf16>, vector<1024x16xbf16>, vector<2x16xf32> -> vector<2x16xf32>
    %72 = vector.extract_strided_slice %71 {offsets = [0, 0], sizes = [1, 16], strides = [1, 1]} : vector<2x16xf32> to vector<1x16xf32>
    %cst_31 = arith.constant 7.812500e-03 : f32
    %73 = vector.broadcast %cst_31 : f32 to vector<1x16xf32>
    %74 = arith.mulf %72, %73 : vector<1x16xf32>
    %75 = vector.extract_strided_slice %71 {offsets = [1, 0], sizes = [1, 16], strides = [1, 1]} : vector<2x16xf32> to vector<1x16xf32>
    %cst_32 = arith.constant 7.812500e-03 : f32
    %76 = vector.broadcast %cst_32 : f32 to vector<1x16xf32>
    %77 = arith.mulf %75, %76 : vector<1x16xf32>
    %78 = arith.mulf %74, %74 : vector<1x16xf32>
    %79 = arith.subf %77, %78 : vector<1x16xf32>
    %cst_33 = arith.constant 0.000000e+00 : f32
    %80 = vector.broadcast %cst_33 : f32 to vector<1x16xf32>
    %81 = arith.maximumf %79, %80 : vector<1x16xf32>
    %cst_34 = arith.constant 9.99999974E-6 : f32
    %82 = vector.broadcast %cst_34 : f32 to vector<1x16xf32>
    %83 = arith.addf %81, %82 : vector<1x16xf32>
    %84 = math.rsqrt %83 : vector<1x16xf32>
    %85 = arith.mulf %54, %84 : vector<1x16xf32>
    %86 = arith.mulf %74, %85 : vector<1x16xf32>
    %87 = arith.subf %55, %86 : vector<1x16xf32>
    %88 = tpu.concatenate %85, %87 in 0 : vector<1x16xf32>, vector<1x16xf32> -> vector<2x16xf32>
    %89 = arith.truncf %88 : vector<2x16xf32> to vector<2x16xbf16>
    %cst_35 = arith.constant dense<0.000000e+00> : vector<2x1024xf32>
    %90 = tpu.matmul %89, %57, %cst_35 {dimension_numbers = #tpu.dot_dimension_numbers<[1], [0], [0], [1], [0, 0, 1, 1], [], []>} : vector<2x16xbf16>, vector<16x1024xbf16>, vector<2x1024xf32> -> vector<2x1024xf32>
    %91 = vector.extract_strided_slice %90 {offsets = [0, 0], sizes = [1, 1024], strides = [1, 1]} : vector<2x1024xf32> to vector<1x1024xf32>
    %92 = vector.broadcast %91 : vector<1x1024xf32> to vector<16x1024xf32>
    %93 = arith.mulf %62, %92 : vector<16x1024xf32>
    %94 = vector.extract_strided_slice %90 {offsets = [1, 0], sizes = [1, 1024], strides = [1, 1]} : vector<2x1024xf32> to vector<1x1024xf32>
    %95 = vector.broadcast %94 : vector<1x1024xf32> to vector<16x1024xf32>
    %96 = arith.addf %93, %95 : vector<16x1024xf32>
    %cst_36 = arith.constant 0.000000e+00 : f32
    %97 = vector.broadcast %cst_36 : f32 to vector<16x1024xf32>
    %98 = arith.maximumf %96, %97 : vector<16x1024xf32>
    %99 = arith.truncf %98 : vector<16x1024xf32> to vector<16x1024xbf16>
    %c6 = arith.constant 6 : index
    %c0_37 = arith.constant 0 : index
    %100 = vector.load %arg1[%c6, %c0_37] : memref<8x1024xf32, #tpu.memory_space<vmem>>, vector<1x128xf32>
    %c0_38 = arith.constant 0 : index
    %c0_39 = arith.constant 0 : index
    %101 = vector.load %arg6[%c0_38, %c0_39] : memref<1024x128xbf16, #tpu.memory_space<vmem>>, vector<1024x128xbf16>
    %cst_40 = arith.constant dense<0.000000e+00> : vector<16x128xf32>
    %102 = tpu.matmul %99, %101, %cst_40 {dimension_numbers = #tpu.dot_dimension_numbers<[1], [0], [0], [1], [0, 0, 1, 1], [], []>} : vector<16x1024xbf16>, vector<1024x128xbf16>, vector<16x128xf32> -> vector<16x128xf32>
    %103 = vector.broadcast %100 : vector<1x128xf32> to vector<16x128xf32>
    %104 = arith.addf %102, %103 : vector<16x128xf32>
    %105 = math.tanh %104 : vector<16x128xf32>
    %c0_41 = arith.constant 0 : index
    %c0_42 = arith.constant 0 : index
    %106 = vector.load %arg7[%c0_41, %c0_42] : memref<16x128xf32, #tpu.memory_space<vmem>>, vector<16x128xf32>
    tpu.vector_store %arg7[%c0_41, %c0_42], %105 {strides = array<i32>} : memref<16x128xf32, #tpu.memory_space<vmem>>, vector<16x128xf32>,
    return
  }
}

</mosaic_0001>

<bundles_post_ra>
// kernel: decoder_forward.1
= control target key start
LH: loop header
LB: loop body
LE: loop exit
PB: predicated region body
PF: predicated region fallthrough
CT: control target
= control target key end

     0   :  { %v3961_v1 = vmov 0   ;;  %vm83_vm0 = vcmask 261120   ;;  %v27_v22 = vlaneseq  ;;  %v3962_v31 = vmov 0.0   ;;  %s5119_s2 = inlined_call_operand.vmem [shape: bf16[48,256], index: 2, kind: input, shape index: {}]   ;;  %s5120_s0 = inlined_call_operand.vmem [shape: bf16[16,32], index: 0, kind: input, shape index: {}]   ;;  %s5121_s3 = inlined_call_operand.vmem [shape: bf16[256,16], index: 3, kind: input, shape index: {}]   ;;  %s5122_s1 = inlined_call_operand.vmem [shape: f32[8,1024], index: 1, kind: input, shape index: {}]   ;;  %s5123_s4 = inlined_call_operand.vmem [shape: bf16[272,1024], index: 4, kind: input, shape index: {}]   ;;  %s5124_s5 = inlined_call_operand.vmem [shape: bf16[1024,16], index: 5, kind: input, shape index: {}]   ;;  %s5125_s6 = inlined_call_operand.vmem [shape: bf16[1024,128], index: 6, kind: input, shape index: {}]   ;;  %s5126_s7 = inlined_call_operand.vmem [shape: f32[16,128], index: 7, kind: output, shape index: {}]  }
   0x1   :  { %v3799_v0 = vld [vmem:[%s5119_s2 + $0x14] ss:$8 sps:$4 sm:$0xff]   ;;  %119 = vmatprep.mubr.bf16.mxu0 %v3961_v1  ;;  %v3801_v2 = vld [vmem:[%s5119_s2 + $0x10] ss:$8 sps:$4 sm:$0xff]   ;;  %v3802_v3 = vld [vmem:[%s5119_s2 + $0x4] ss:$8 sps:$4 sm:$0xff]  }
   0x2   :  { %99 = vmatprep.subr.bf16.mxu0 %v3799_v0  ;;  %v3804_v4 = vld [vmem:[%s5119_s2] ss:$8 sps:$4 sm:$0xff]   ;;  %v3806_v5 = vld [vmem:[%s5121_s3 + $0x78] sm:$0xff]   ;;  %v3808_v8 = vld [vmem:[%s5121_s3 + $0x70] sm:$0xff]   ;;  %v4068_v23 = vshrl.u32 %v27_v22, 7  ;;  %vm166_vm2 = vcmask 1040384  }
   0x3   :  { %100 = vmatpush1.bf16.msra.mxu0 %v3801_v2  ;;  %v3805_v6 = vld [vmem:[%s5120_s0] sm:$0xff]   ;;  %3599 = vmatprep.subr.bf16.mxu1 %v3806_v5  ;;  %v3807_v7 = vld [vmem:[%s5121_s3 + $0x38] sm:$0xff]   ;;  %v3809_v9 = vld [vmem:[%s5121_s3 + $0x30] sm:$0xff]   ;;  %vm369_vm3 = vcmask 130048  }
   0x4   :  { %101 = vmatprep.subr.bf16.mxu0 %v3802_v3  ;;  %3600 = vmatpush3.bf16.msra.mxu1 %v3807_v7  ;;  %v3810_v10 = vld [vmem:[%s5121_s3 + $0x68] sm:$0xff]   ;;  %v3812_v12 = vld [vmem:[%s5121_s3 + $0x60] sm:$0xff]   ;;  %v3814_v14 = vld [vmem:[%s5121_s3 + $0x58] sm:$0xff]   ;;  %v4071_v24 = vsub.s32 0, %v4068_v23  ;;  %v4077_v26 = vsub.s32 1, %v4068_v23  ;;  %vm30_vm1 = vcmp.lt.s32.totalorder %v4068_v23, 2 }
   0x5   :  { %3601 = vmatprep.subr.bf16.mxu1 %v3808_v8  ;;  %v3811_v11 = vld [vmem:[%s5121_s3 + $0x28] sm:$0xff]   ;;  %v3813_v13 = vld [vmem:[%s5121_s3 + $0x20] sm:$0xff]   ;;  %v3815_v15 = vld [vmem:[%s5121_s3 + $0x18] sm:$0xff]   ;;  %v4082_v32 = vsel %vm30_vm1, 1.0, %v3962_v31 }
   0x6   :  { %v3816_v16 = vld [vmem:[%s5121_s3 + $0x50] sm:$0xff]   ;;  %v3818_v18 = vld [vmem:[%s5121_s3 + $0x48] sm:$0xff]   ;;  %v3820_v20 = vld [vmem:[%s5121_s3 + $0x40] sm:$0xff]  }
   0x7   :  { %102 = vmatpush1.bf16.msra.mxu0 %v3804_v4  ;;  %v3817_v17 = vld [vmem:[%s5121_s3 + $0x10] sm:$0xff]   ;;  %v3819_v19 = vld [vmem:[%s5121_s3 + $0x8] sm:$0xff]   ;;  %v3821_v21 = vld [vmem:[%s5121_s3] sm:$0xff]  }
   0x8   :  { %3602 = vmatpush3.bf16.msra.mxu1 %v3809_v9  ;;  %v38_v25 = vld [vmem:[%s5122_s1] ss:$8 sm:$0x3] }
   0x9   :  { %3603 = vmatprep.subr.bf16.mxu1 %v3810_v10  ;;  %v51_v27 = vrot.slane %v38_v25, %v4071_v24  ;;  %v55_v28 = vrot.slane %v38_v25, %v4077_v26  ;;  %v511_v25 = vld [vmem:[%s5123_s4 + $0x1e8] sm:$0xff] }
   0xa   :  { %3309 = vmatmul.mubr.msk.bf16.vlgmr.msra.gmra.mxu0 %vm83_vm0, %v3805_v6 }
   0xb   :  { %405 = vmatprep.mubr.bf16.mxu0 %v3961_v1 }
   0xc   :  { %3604 = vmatpush3.bf16.msra.mxu1 %v3811_v11 }
   0xd   :  { %3605 = vmatprep.subr.bf16.mxu1 %v3812_v12 }
  0x10   :  { %3606 = vmatpush3.bf16.msra.mxu1 %v3813_v13 }
  0x11   :  { %3607 = vmatprep.subr.bf16.mxu1 %v3814_v14 }
  0x14   :  { %3608 = vmatpush3.bf16.msra.mxu1 %v3815_v15 }
  0x15   :  { %3609 = vmatprep.subr.bf16.mxu1 %v3816_v16  ;;  %v3824_v16 = vld [vmem:[%s5119_s2 + $0x24] ss:$8 sps:$4 sm:$0xff]  }
  0x16   :  { %387 = vmatprep.subr.bf16.mxu0 %v3824_v16  ;;  %v543_v16 = vld [vmem:[%s5123_s4 + $0x2e8] sm:$0xff] }
  0x18   :  { %3610 = vmatpush3.bf16.msra.mxu1 %v3817_v17  ;;  %v3822_v17 = vld [vmem:[%s5119_s2 + $0x20] ss:$8 sps:$4 sm:$0xff]  }
  0x19   :  { %3611 = vmatprep.subr.bf16.mxu1 %v3818_v18  ;;  %388 = vmatpush1.bf16.msra.mxu0 %v3822_v17  ;;  %v4117_v18 = vld [vmem:[%s5123_s4 + $0x1c0] sm:$0xff] }
  0x1c   :  { %3612 = vmatpush3.bf16.msra.mxu1 %v3819_v19  ;;  %v4122_v19 = vld [vmem:[%s5123_s4 + $0x1e0] sm:$0xff] }
  0x1d   :  { %3613 = vmatprep.subr.bf16.mxu1 %v3820_v20  ;;  %v507_v20 = vld [vmem:[%s5123_s4 + $0x1c8] sm:$0xff]  ;;  %v3388_v22 = vcombine.high %v4117_v18, %v4122_v19 }
  0x1f   :  { %1267 = vmatprep.subr.bf16.mxu0 %v3388_v22 }
  0x20   :  { %3614 = vmatpush3.bf16.msra.mxu1 %v3821_v21  ;;  %v3387_v21 = vcombine.low %v4117_v18, %v4122_v19  ;;  %v474_v18 = vld [vmem:[%s5123_s4 + $0xc0] sm:$0xff] }
  0x21   :  { %v478_v19 = vld [vmem:[%s5123_s4 + $0xe0] sm:$0xff] }
  0xca   :  { %v121_v29 = vpop.f32.mrf.mxu0 }
  0xcb   :  { %v122_v30 = vadd.f32 %v121_v29, %v51_v27  ;;  %v499_v29 = vld [vmem:[%s5123_s4 + $0x188] sm:$0xff] }
  0xcc   :  { %v123_v33 = vpop.f32.mrf.mxu0 }
  0xcd   :  { %v124_v34 = vadd.f32 %v123_v33, %v55_v28  ;;  %v4085_v36 = vmul.f32 %v4082_v32, %v122_v30  ;;  %v503_v30 = vld [vmem:[%s5123_s4 + $0x1a8] sm:$0xff] }
  0xce   :  { %v125_v35 = vpop.f32.mrf.mxu0  ;;  %v3382_v31 = vcombine.high %v499_v29, %v503_v30  ;;  %v3381_v33 = vcombine.low %v499_v29, %v503_v30 }
  0xcf   :  { %v126_v37 = vadd.f32 %v125_v35, %v51_v27  ;;  %v4088_v38 = vmul.f32 %v4082_v32, %v124_v34  ;;  %v148_v42 = vmul.f32 %v4085_v36, %v4085_v36  ;;  %v3389_v27 = vcombine.low %v507_v20, %v511_v25  ;;  %v491_v34 = vld [vmem:[%s5123_s4 + $0x148] sm:$0xff] }
  0xd0   :  { %v127_v39 = vpop.f32.mrf.mxu0  ;;  %v495_v35 = vld [vmem:[%s5123_s4 + $0x168] sm:$0xff] }
  0xd1   :  { %v4090_v40 = vmul.f32 0.0, %v126_v37  ;;  %v128_v41 = vadd.f32 %v127_v39, %v55_v28  ;;  %v149_v46 = vmul.f32 %v4088_v38, %v4088_v38  ;;  %v3390_v28 = vcombine.high %v507_v20, %v511_v25 }
  0xd2   :  { %v3374_v37 = vcombine.high %v491_v34, %v495_v35  ;;  %v3373_v39 = vcombine.low %v491_v34, %v495_v35 }
  0xd3   :  { %v134_v43 = vadd.f32 %v4090_v40, %v4085_v36  ;;  %v150_v44 = vmul.f32 %v4090_v40, %v4090_v40  ;;  %v4098_v45 = vmul.f32 0.0, %v128_v41  ;;  %1310 = vmatprep.subr.bf16.mxu1 %v3390_v28  ;;  %v483_v41 = vld [vmem:[%s5123_s4 + $0x108] sm:$0xff] }
  0xd5   :  { %v135_v47 = vrot.slane %v134_v43, 4  ;;  %v152_v48 = vadd.f32 %v150_v44, %v148_v42  ;;  %v141_v49 = vadd.f32 %v4098_v45, %v4088_v38  ;;  %v151_v50 = vmul.f32 %v4098_v45, %v4098_v45  ;;  %v487_v42 = vld [vmem:[%s5123_s4 + $0x128] sm:$0xff] }
  0xd6   :  { %v3365_v44 = vcombine.low %v483_v41, %v487_v42 }
  0xd7   :  { %v136_v51 = vadd.f32 %v135_v47, %v134_v43  ;;  %v153_v52 = vrot.slane %v152_v48, 4  ;;  %v142_v53 = vrot.slane %v141_v49, 4  ;;  %v159_v54 = vadd.f32 %v151_v50, %v149_v46  ;;  %v475_v46 = vld [vmem:[%s5123_s4 + $0xc8] sm:$0xff] }
  0xd8   :  { %v3366_v43 = vcombine.high %v483_v41, %v487_v42  ;;  %v479_v47 = vld [vmem:[%s5123_s4 + $0xe8] sm:$0xff] }
  0xd9   :  { %v137_v55 = vrot.slane %v136_v51, 2  ;;  %v154_v56 = vadd.f32 %v153_v52, %v152_v48  ;;  %v143_v57 = vadd.f32 %v142_v53, %v141_v49  ;;  %v160_v58 = vrot.slane %v159_v54, 4  ;;  %v467_v50 = vld [vmem:[%s5123_s4 + $0x88] sm:$0xff] }
  0xda   :  { %v3358_v48 = vcombine.high %v475_v46, %v479_v47  ;;  %v3357_v49 = vcombine.low %v475_v46, %v479_v47 }
  0xdb   :  { %v138_v59 = vadd.f32 %v137_v55, %v136_v51  ;;  %v155_v60 = vrot.slane %v154_v56, 2  ;;  %v144_v61 = vrot.slane %v143_v57, 2  ;;  %v161_v62 = vadd.f32 %v160_v58, %v159_v54  ;;  %v471_v51 = vld [vmem:[%s5123_s4 + $0xa8] sm:$0xff] }
  0xdc   :  { %v3350_v52 = vcombine.high %v467_v50, %v471_v51  ;;  %v3349_v53 = vcombine.low %v467_v50, %v471_v51  ;;  %v459_v54 = vld [vmem:[%s5123_s4 + $0x48] sm:$0xff]  ;;  %v502_v50 = vld [vmem:[%s5123_s4 + $0x1a0] sm:$0xff] }
  0xdd   :  { %v145_v63 = vadd.f32 %v144_v61, %v143_v57  ;;  %v162_v0 = vrot.slane %v161_v62, 2  ;;  %v156_v2 = vadd.f32 %v155_v60, %v154_v56  ;;  %v139_v3 = vrot.slane %v138_v59, 1  ;;  %v463_v55 = vld [vmem:[%s5123_s4 + $0x68] sm:$0xff] }
  0xde   :  { %v3342_v56 = vcombine.high %v459_v54, %v463_v55  ;;  %v3341_v57 = vcombine.low %v459_v54, %v463_v55  ;;  %v451_v58 = vld [vmem:[%s5123_s4 + $0x8] sm:$0xff]  ;;  %v490_v54 = vld [vmem:[%s5123_s4 + $0x140] sm:$0xff] }
  0xdf   :  { %v146_v4 = vrot.slane %v145_v63, 1  ;;  %v163_v5 = vadd.f32 %v162_v0, %v161_v62  ;;  %v157_v6 = vrot.slane %v156_v2, 1  ;;  %v140_v9 = vadd.f32 %v139_v3, %v138_v59  ;;  %v455_v59 = vld [vmem:[%s5123_s4 + $0x28] sm:$0xff]  ;;  %v494_v55 = vld [vmem:[%s5123_s4 + $0x160] sm:$0xff] }
  0xe0   :  { %v3334_v60 = vcombine.high %v451_v58, %v455_v59  ;;  %v3333_v61 = vcombine.low %v451_v58, %v455_v59  ;;  %v571_v62 = vld [vmem:[%s5123_s4 + $0x3c8] sm:$0xff]  ;;  %v482_v58 = vld [vmem:[%s5123_s4 + $0x100] sm:$0xff] }
  0xe1   :  { %v164_v7 = vrot.slane %v163_v5, 1  ;;  %v158_v8 = vadd.f32 %v157_v6, %v156_v2  ;;  %v147_v10 = vadd.f32 %v146_v4, %v145_v63  ;;  %v575_v63 = vld [vmem:[%s5123_s4 + $0x3e8] sm:$0xff]  ;;  %v486_v59 = vld [vmem:[%s5123_s4 + $0x120] sm:$0xff] }
  0xe2   :  { %v3454_v0 = vcombine.high %v571_v62, %v575_v63  ;;  %v3453_v2 = vcombine.low %v571_v62, %v575_v63  ;;  %v563_v3 = vld [vmem:[%s5123_s4 + $0x388] sm:$0xff]  ;;  %v3356_v62 = vcombine.high %v474_v18, %v478_v19  ;;  %v466_v63 = vld [vmem:[%s5123_s4 + $0x80] sm:$0xff] }
  0xe3   :  { %v165_v11 = vadd.f32 %v164_v7, %v163_v5  ;;  %v167_v12 = vsel %vm166_vm2, %v140_v9, %v158_v8  ;;  %v567_v4 = vld [vmem:[%s5123_s4 + $0x3a8] sm:$0xff] }
  0xe4   :  { %v169_v15 = vpack.c.bf16 %v167_v12, %v167_v12  ;;  %v3446_v5 = vcombine.high %v563_v3, %v567_v4  ;;  %v3445_v6 = vcombine.low %v563_v3, %v567_v4  ;;  %v555_v7 = vld [vmem:[%s5123_s4 + $0x348] sm:$0xff]  ;;  %v458_v4 = vld [vmem:[%s5123_s4 + $0x40] sm:$0xff] }
  0xe5   :  { %v168_v13 = vsel %vm166_vm2, %v147_v10, %v165_v11  ;;  %v559_v8 = vld [vmem:[%s5123_s4 + $0x368] sm:$0xff] }
  0xe6   :  { %v170_v14 = vpack.c.bf16 %v168_v13, %v168_v13  ;;  %v3438_v9 = vcombine.high %v555_v7, %v559_v8  ;;  %v3437_v10 = vcombine.low %v555_v7, %v559_v8  ;;  %v547_v11 = vld [vmem:[%s5123_s4 + $0x308] sm:$0xff]  ;;  %v450_v8 = vld [vmem:[%s5123_s4] sm:$0xff] }
  0xe7   :  { %v551_v12 = vld [vmem:[%s5123_s4 + $0x328] sm:$0xff] }
  0xe8   :  { %331 = vmatprep.mubr.bf16.mxu1 %v170_v14  ;;  %v3430_v13 = vcombine.high %v547_v11, %v551_v12  ;;  %v3429_v14 = vcombine.low %v547_v11, %v551_v12  ;;  %v570_v12 = vld [vmem:[%s5123_s4 + $0x3c0] sm:$0xff] }
  0xe9   :  { %332 = vmatmul.mubr.bf16.vlgmr.msra.gmra.mxu1 %v169_v15  ;;  %v539_v15 = vld [vmem:[%s5123_s4 + $0x2c8] sm:$0xff] }
  0xea   :  { %1311 = vmatpush1.bf16.msra.mxu1 %v3389_v27  ;;  %v3422_v17 = vcombine.high %v539_v15, %v543_v16  ;;  %v3421_v20 = vcombine.low %v539_v15, %v543_v16  ;;  %v562_v16 = vld [vmem:[%s5123_s4 + $0x380] sm:$0xff] }
  0xeb   :  { %1312 = vmatprep.subr.bf16.mxu1 %v3382_v31 }
  0xee   :  { %1313 = vmatpush1.bf16.msra.mxu1 %v3381_v33 }
  0xef   :  { %1314 = vmatprep.subr.bf16.mxu1 %v3374_v37 }
  0xf2   :  { %1315 = vmatpush1.bf16.msra.mxu1 %v3373_v39  ;;  %v39_v39 = vld [vmem:[%s5122_s1 + $0x1] ss:$0 sm:$0xff] }
  0xf3   :  { %1316 = vmatprep.subr.bf16.mxu1 %v3366_v43 }
  0xf6   :  { %1317 = vmatpush1.bf16.msra.mxu1 %v3365_v44  ;;  %v40_v44 = vld [vmem:[%s5122_s1 + $0x2] ss:$0 sm:$0xff] }
  0xf7   :  { %1318 = vmatprep.subr.bf16.mxu1 %v3358_v48 }
  0xfa   :  { %1319 = vmatpush1.bf16.msra.mxu1 %v3357_v49  ;;  %v498_v49 = vld [vmem:[%s5123_s4 + $0x180] sm:$0xff] }
  0xfb   :  { %1320 = vmatprep.subr.bf16.mxu1 %v3350_v52 }
  0xfe   :  { %1321 = vmatpush1.bf16.msra.mxu1 %v3349_v53  ;;  %v3380_v53 = vcombine.high %v498_v49, %v502_v50 }
  0xff   :  { %1322 = vmatprep.subr.bf16.mxu1 %v3342_v56  ;;  %v3379_v56 = vcombine.low %v498_v49, %v502_v50 }
 0x102   :  { %1323 = vmatpush1.bf16.msra.mxu1 %v3341_v57  ;;  %v3372_v57 = vcombine.high %v490_v54, %v494_v55 }
 0x103   :  { %1324 = vmatprep.subr.bf16.mxu1 %v3334_v60  ;;  %v3371_v60 = vcombine.low %v490_v54, %v494_v55  ;;  %v523_v54 = vld [vmem:[%s5123_s4 + $0x248] sm:$0xff] }
 0x106   :  { %1325 = vmatpush1.bf16.msra.mxu1 %v3333_v61  ;;  %v3364_v61 = vcombine.high %v482_v58, %v486_v59 }
 0x107   :  { %1326 = vmatprep.subr.bf16.mxu1 %v3454_v0  ;;  %v470_v0 = vld [vmem:[%s5123_s4 + $0xa0] sm:$0xff] }
 0x108   :  { %v3348_v3 = vcombine.high %v466_v63, %v470_v0 }
 0x10a   :  { %1327 = vmatpush2.bf16.msra.mxu1 %v3453_v2  ;;  %v3355_v2 = vcombine.low %v474_v18, %v478_v19  ;;  %v515_v18 = vld [vmem:[%s5123_s4 + $0x208] sm:$0xff] }
 0x10b   :  { %1328 = vmatprep.subr.bf16.mxu1 %v3446_v5  ;;  %v462_v5 = vld [vmem:[%s5123_s4 + $0x60] sm:$0xff] }
 0x10c   :  { %v3340_v7 = vcombine.high %v458_v4, %v462_v5 }
 0x10e   :  { %1329 = vmatpush2.bf16.msra.mxu1 %v3445_v6  ;;  %v3347_v6 = vcombine.low %v466_v63, %v470_v0 }
 0x10f   :  { %1330 = vmatprep.subr.bf16.mxu1 %v3438_v9  ;;  %v454_v9 = vld [vmem:[%s5123_s4 + $0x20] sm:$0xff] }
 0x110   :  { %v3332_v11 = vcombine.high %v450_v8, %v454_v9 }
 0x112   :  { %1331 = vmatpush2.bf16.msra.mxu1 %v3437_v10  ;;  %v3339_v10 = vcombine.low %v458_v4, %v462_v5  ;;  %v509_v4 = vld [vmem:[%s5123_s4 + $0x1d8] sm:$0xff] }
 0x113   :  { %1332 = vmatprep.subr.bf16.mxu1 %v3430_v13  ;;  %v574_v13 = vld [vmem:[%s5123_s4 + $0x3e0] sm:$0xff] }
 0x114   :  { %v3452_v15 = vcombine.high %v570_v12, %v574_v13 }
 0x116   :  { %1333 = vmatpush2.bf16.msra.mxu1 %v3429_v14  ;;  %v3331_v14 = vcombine.low %v450_v8, %v454_v9 }
 0x117   :  { %1334 = vmatprep.subr.bf16.mxu1 %v3422_v17  ;;  %v566_v17 = vld [vmem:[%s5123_s4 + $0x3a0] sm:$0xff] }
 0x11a   :  { %1335 = vmatpush2.bf16.msra.mxu1 %v3421_v20  ;;  %v3451_v20 = vcombine.low %v570_v12, %v574_v13 }
 0x1a9   :  { %v3615_v22 = vpop.f32.mrf.mxu1 }
 0x1ab   :  { %v3616_v25 = vpop.f32.mrf.mxu1 }
 0x1ac   :  { %v3617_v27 = vadd.f32 %v3616_v25, %v3615_v22  ;;  %v3444_v22 = vcombine.high %v562_v16, %v566_v17  ;;  %v554_v25 = vld [vmem:[%s5123_s4 + $0x340] sm:$0xff] }
 0x1ad   :  { %v3618_v28 = vpop.f32.mrf.mxu1 }
 0x1ae   :  { %v339_v29 = vmul.f32 0.03125, %v3617_v27  ;;  %v558_v27 = vld [vmem:[%s5123_s4 + $0x360] sm:$0xff]  ;;  %v3443_v28 = vcombine.low %v562_v16, %v566_v17 }
 0x1af   :  { %v3619_v30 = vpop.f32.mrf.mxu1 }
 0x1b0   :  { %v340_v31 = vmul.f32 %v339_v29, %v339_v29  ;;  %v546_v30 = vld [vmem:[%s5123_s4 + $0x300] sm:$0xff] }
 0x1b2   :  { %v342_v33 = vrot.slane %v340_v31, 7  ;;  %v550_v31 = vld [vmem:[%s5123_s4 + $0x320] sm:$0xff] }
 0x1b4   :  { %v344_v34 = vsub.f32 %v339_v29, %v342_v33  ;;  %v3435_v33 = vcombine.low %v554_v25, %v558_v27 }
 0x1b6   :  { %v345_v35 = vmax.f32 %v344_v34, 0.0  ;;  %v3428_v34 = vcombine.high %v546_v30, %v550_v31 }
 0x1b8   :  { %v346_v37 = vadd.f32 1e-05, %v345_v35  ;;  %v538_v35 = vld [vmem:[%s5123_s4 + $0x2c0] sm:$0xff] }
 0x1ba   :  { %3953 = vrsqrt.f32 %v346_v37  ;;  %v542_v37 = vld [vmem:[%s5123_s4 + $0x2e0] sm:$0xff] }
 0x1c7   :  { %v3954_v41 = vpop.eup %3953 }
 0x1c8   :  { %v348_v42 = vmul.f32 %v3954_v41, %v39_v39  ;;  %v3427_v39 = vcombine.low %v546_v30, %v550_v31  ;;  %v3420_v41 = vcombine.high %v538_v35, %v542_v37 }
 0x1ca   :  { %v350_v43 = vrot.slane %v348_v42, 1  ;;  %v3419_v42 = vcombine.low %v538_v35, %v542_v37  ;;  %v500_v35 = vld [vmem:[%s5123_s4 + $0x190] sm:$0xff] }
 0x1cb   :  { %v504_v37 = vld [vmem:[%s5123_s4 + $0x1b0] sm:$0xff] }
 0x1cc   :  { %v352_v46 = vmul.f32 %v350_v43, %v339_v29  ;;  %v3436_v29 = vcombine.high %v554_v25, %v558_v27 }
 0x1ce   :  { %v353_v47 = vsub.f32 %v40_v44, %v352_v46  ;;  %v534_v44 = vld [vmem:[%s5123_s4 + $0x2a0] sm:$0xff]  ;;  %v531_v46 = vld [vmem:[%s5123_s4 + $0x288] sm:$0xff] }
 0x1d0   :  { %v355_v48 = vrot.slane %v353_v47, 7 }
 0x1d2   :  { %v357_v51 = vsel %vm166_vm2, %v350_v43, %v355_v48  ;;  %v530_v43 = vld [vmem:[%s5123_s4 + $0x280] sm:$0xff]  ;;  %v535_v48 = vld [vmem:[%s5123_s4 + $0x2a8] sm:$0xff] }
 0x1d3   :  { %v358_v52 = vpack.c.bf16 %v357_v51, %v357_v51  ;;  %v3412_v47 = vcombine.high %v530_v43, %v534_v44  ;;  %v3411_v49 = vcombine.low %v530_v43, %v534_v44  ;;  %v3413_v50 = vcombine.low %v531_v46, %v535_v48 }
 0x1d4   :  { %v3414_v51 = vcombine.high %v531_v46, %v535_v48  ;;  %v3384_v43 = vcombine.high %v500_v35, %v504_v37  ;;  %v496_v46 = vld [vmem:[%s5123_s4 + $0x170] sm:$0xff]  ;;  %v497_v48 = vld [vmem:[%s5123_s4 + $0x178] sm:$0xff] }
 0x1d5   :  { %3328 = vmatmul.mubr.msk.bf16.vlgmr.msra.gmra.mxu0 %vm369_vm3, %v358_v52  ;;  %v522_v52 = vld [vmem:[%s5123_s4 + $0x240] sm:$0xff] }
 0x1d6   :  { %1268 = vmatpush1.bf16.msra.mxu0 %v3387_v21  ;;  %v3363_v21 = vcombine.low %v482_v58, %v486_v59  ;;  %1336 = vmatprep.subr.bf16.mxu1 %v3414_v51 }
 0x1d7   :  { %1269 = vmatprep.subr.bf16.mxu0 %v3380_v53  ;;  %v526_v53 = vld [vmem:[%s5123_s4 + $0x260] sm:$0xff]  ;;  %1337 = vmatpush2.bf16.msra.mxu1 %v3413_v50 }
 0x1d8   :  { %v3404_v55 = vcombine.high %v522_v52, %v526_v53 }
 0x1da   :  { %1270 = vmatpush1.bf16.msra.mxu0 %v3379_v56  ;;  %v527_v56 = vld [vmem:[%s5123_s4 + $0x268] sm:$0xff] }
 0x1db   :  { %1271 = vmatprep.subr.bf16.mxu0 %v3372_v57  ;;  %v3403_v57 = vcombine.low %v522_v52, %v526_v53  ;;  %v3405_v58 = vcombine.low %v523_v54, %v527_v56  ;;  %v3406_v59 = vcombine.high %v523_v54, %v527_v56  ;;  %v484_v53 = vld [vmem:[%s5123_s4 + $0x110] sm:$0xff]  ;;  %v489_v56 = vld [vmem:[%s5123_s4 + $0x138] sm:$0xff] }
 0x1dc   :  { %v488_v54 = vld [vmem:[%s5123_s4 + $0x130] sm:$0xff] }
 0x1dd   :  { %1338 = vmatprep.subr.bf16.mxu1 %v3406_v59  ;;  %v3368_v59 = vcombine.high %v484_v53, %v488_v54 }
 0x1de   :  { %1272 = vmatpush1.bf16.msra.mxu0 %v3371_v60  ;;  %v514_v60 = vld [vmem:[%s5123_s4 + $0x200] sm:$0xff]  ;;  %1339 = vmatpush2.bf16.msra.mxu1 %v3405_v58 }
 0x1df   :  { %1273 = vmatprep.subr.bf16.mxu0 %v3364_v61  ;;  %v518_v61 = vld [vmem:[%s5123_s4 + $0x220] sm:$0xff] }
 0x1e0   :  { %v3396_v19 = vcombine.high %v514_v60, %v518_v61 }
 0x1e2   :  { %1274 = vmatpush1.bf16.msra.mxu0 %v3363_v21  ;;  %v519_v21 = vld [vmem:[%s5123_s4 + $0x228] sm:$0xff] }
 0x1e3   :  { %1275 = vmatprep.subr.bf16.mxu0 %v3356_v62  ;;  %v3395_v62 = vcombine.low %v514_v60, %v518_v61  ;;  %v3397_v63 = vcombine.low %v515_v18, %v519_v21  ;;  %v3398_v0 = vcombine.high %v515_v18, %v519_v21  ;;  %v476_v61 = vld [vmem:[%s5123_s4 + $0xd0] sm:$0xff]  ;;  %v481_v21 = vld [vmem:[%s5123_s4 + $0xf8] sm:$0xff] }
 0x1e4   :  { %v480_v18 = vld [vmem:[%s5123_s4 + $0xf0] sm:$0xff] }
 0x1e5   :  { %1340 = vmatprep.subr.bf16.mxu1 %v3398_v0  ;;  %v3360_v0 = vcombine.high %v476_v61, %v480_v18 }
 0x1e6   :  { %1276 = vmatpush1.bf16.msra.mxu0 %v3355_v2  ;;  %v508_v2 = vld [vmem:[%s5123_s4 + $0x1d0] sm:$0xff]  ;;  %1341 = vmatpush2.bf16.msra.mxu1 %v3397_v63 }
 0x1e7   :  { %1277 = vmatprep.subr.bf16.mxu0 %v3348_v3  ;;  %v512_v3 = vld [vmem:[%s5123_s4 + $0x1f0] sm:$0xff] }
 0x1e8   :  { %v3392_v5 = vcombine.high %v508_v2, %v512_v3 }
 0x1ea   :  { %1278 = vmatpush1.bf16.msra.mxu0 %v3347_v6  ;;  %v513_v6 = vld [vmem:[%s5123_s4 + $0x1f8] sm:$0xff] }
 0x1eb   :  { %1279 = vmatprep.subr.bf16.mxu0 %v3340_v7  ;;  %v3391_v7 = vcombine.low %v508_v2, %v512_v3  ;;  %v3393_v8 = vcombine.low %v509_v4, %v513_v6  ;;  %v3394_v9 = vcombine.high %v509_v4, %v513_v6  ;;  %v468_v3 = vld [vmem:[%s5123_s4 + $0x90] sm:$0xff]  ;;  %v473_v6 = vld [vmem:[%s5123_s4 + $0xb8] sm:$0xff] }
 0x1ec   :  { %v472_v4 = vld [vmem:[%s5123_s4 + $0xb0] sm:$0xff] }
 0x1ed   :  { %1396 = vmatprep.subr.bf16.mxu1 %v3394_v9  ;;  %v3352_v9 = vcombine.high %v468_v3, %v472_v4 }
 0x1ee   :  { %1280 = vmatpush1.bf16.msra.mxu0 %v3339_v10 }
 0x1ef   :  { %1281 = vmatprep.subr.bf16.mxu0 %v3332_v11 }
 0x1f2   :  { %1282 = vmatpush1.bf16.msra.mxu0 %v3331_v14 }
 0x1f3   :  { %1283 = vmatprep.subr.bf16.mxu0 %v3452_v15 }
 0x1f6   :  { %1284 = vmatpush2.bf16.msra.mxu0 %v3451_v20 }
 0x1f7   :  { %1285 = vmatprep.subr.bf16.mxu0 %v3444_v22 }
 0x1fa   :  { %1286 = vmatpush2.bf16.msra.mxu0 %v3443_v28 }
 0x1fb   :  { %1287 = vmatprep.subr.bf16.mxu0 %v3436_v29 }
 0x1fe   :  { %1288 = vmatpush2.bf16.msra.mxu0 %v3435_v33 }
 0x1ff   :  { %1289 = vmatprep.subr.bf16.mxu0 %v3428_v34 }
 0x202   :  { %1290 = vmatpush2.bf16.msra.mxu0 %v3427_v39 }
 0x203   :  { %1291 = vmatprep.subr.bf16.mxu0 %v3420_v41 }
 0x206   :  { %1292 = vmatpush2.bf16.msra.mxu0 %v3419_v42  ;;  %v492_v42 = vld [vmem:[%s5123_s4 + $0x150] sm:$0xff] }
 0x207   :  { %1293 = vmatprep.subr.bf16.mxu0 %v3412_v47  ;;  %v493_v47 = vld [vmem:[%s5123_s4 + $0x158] sm:$0xff]  ;;  %v3376_v51 = vcombine.high %v492_v42, %v496_v46 }
 0x208   :  { %v3378_v52 = vcombine.high %v493_v47, %v497_v48  ;;  %v3377_v58 = vcombine.low %v493_v47, %v497_v48 }
 0x20a   :  { %1294 = vmatpush2.bf16.msra.mxu0 %v3411_v49  ;;  %v3383_v49 = vcombine.low %v500_v35, %v504_v37  ;;  %v577_v35 = vld [vmem:[%s5123_s4 + $0x3f8] sm:$0xff] }
 0x20b   :  { %1295 = vmatprep.subr.bf16.mxu0 %v3404_v55  ;;  %v485_v55 = vld [vmem:[%s5123_s4 + $0x118] sm:$0xff] }
 0x20c   :  { %v3370_v60 = vcombine.high %v485_v55, %v489_v56  ;;  %v3369_v63 = vcombine.low %v485_v55, %v489_v56 }
 0x20e   :  { %1296 = vmatpush2.bf16.msra.mxu0 %v3403_v57  ;;  %v3375_v57 = vcombine.low %v492_v42, %v496_v46  ;;  %v564_v42 = vld [vmem:[%s5123_s4 + $0x390] sm:$0xff]  ;;  %v569_v46 = vld [vmem:[%s5123_s4 + $0x3b8] sm:$0xff] }
 0x20f   :  { %1297 = vmatprep.subr.bf16.mxu0 %v3396_v19  ;;  %v477_v19 = vld [vmem:[%s5123_s4 + $0xd8] sm:$0xff] }
 0x210   :  { %v3362_v2 = vcombine.high %v477_v19, %v481_v21 }
 0x212   :  { %1298 = vmatpush2.bf16.msra.mxu0 %v3395_v62  ;;  %v3367_v62 = vcombine.low %v484_v53, %v488_v54  ;;  %v557_v53 = vld [vmem:[%s5123_s4 + $0x358] sm:$0xff] }
 0x213   :  { %1353 = vmatprep.subr.bf16.mxu0 %v3392_v5  ;;  %v469_v5 = vld [vmem:[%s5123_s4 + $0x98] sm:$0xff] }
 0x214   :  { %v561_v54 = vld [vmem:[%s5123_s4 + $0x378] sm:$0xff] }
 0x295   :  { %v407_v10 = vpop.f32.mrf.mxu0 }
 0x296   :  { %v417_v11 = vrot.slane %v407_v10, %v4071_v24  ;;  %v429_v15 = vrot.slane %v407_v10, %v4077_v26  ;;  %v3354_v10 = vcombine.high %v469_v5, %v473_v6 }
 0x297   :  { %v409_v12 = vpop.f32.mrf.mxu0 }
 0x298   :  { %v422_v13 = vmul.f32 %v417_v11, %v4085_v36  ;;  %v424_v14 = vmul.f32 %v417_v11, %v4090_v40  ;;  %v421_v16 = vrot.slane %v409_v12, %v4071_v24  ;;  %v433_v17 = vrot.slane %v409_v12, %v4077_v26  ;;  %v460_v11 = vld [vmem:[%s5123_s4 + $0x50] sm:$0xff] }
 0x299   :  { %v411_v20 = vpop.f32.mrf.mxu0  ;;  %v464_v12 = vld [vmem:[%s5123_s4 + $0x70] sm:$0xff] }
 0x29a   :  { %v434_v22 = vadd.f32 %v429_v15, %v422_v13  ;;  %v436_v25 = vadd.f32 %v429_v15, %v424_v14  ;;  %v423_v27 = vmul.f32 %v421_v16, %v4088_v38  ;;  %v425_v28 = vmul.f32 %v421_v16, %v4098_v45  ;;  %v501_v38 = vld [vmem:[%s5123_s4 + $0x198] sm:$0xff] }
 0x29b   :  { %v412_v29 = vpop.f32.mrf.mxu0  ;;  %v505_v45 = vld [vmem:[%s5123_s4 + $0x1b8] sm:$0xff]  ;;  %v3351_v15 = vcombine.low %v468_v3, %v472_v4  ;;  %v3353_v16 = vcombine.low %v469_v5, %v473_v6 }
 0x29c   :  { %v435_v30 = vadd.f32 %v433_v17, %v423_v27  ;;  %v437_v31 = vadd.f32 %v433_v17, %v425_v28  ;;  %v438_v33 = vmax.f32 %v434_v22, 0.0  ;;  %v440_v36 = vmax.f32 %v436_v25, 0.0  ;;  %v461_v13 = vld [vmem:[%s5123_s4 + $0x58] sm:$0xff]  ;;  %v452_v22 = vld [vmem:[%s5123_s4 + $0x10] sm:$0xff] }
 0x29d   :  { %v3386_v44 = vcombine.high %v501_v38, %v505_v45  ;;  %v3385_v50 = vcombine.low %v501_v38, %v505_v45  ;;  %v465_v14 = vld [vmem:[%s5123_s4 + $0x78] sm:$0xff]  ;;  %v3344_v17 = vcombine.high %v460_v11, %v464_v12  ;;  %v456_v25 = vld [vmem:[%s5123_s4 + $0x30] sm:$0xff]  ;;  %v3343_v29 = vcombine.low %v460_v11, %v464_v12 }
 0x29e   :  { %v439_v34 = vmax.f32 %v435_v30, 0.0  ;;  %v441_v40 = vmax.f32 %v437_v31, 0.0  ;;  %v4357_v41 = vpack.c.bf16 %v440_v36, %v438_v33  ;;  %v3346_v20 = vcombine.high %v461_v13, %v465_v14  ;;  %v453_v27 = vld [vmem:[%s5123_s4 + $0x18] sm:$0xff]  ;;  %v572_v36 = vld [vmem:[%s5123_s4 + $0x3d0] sm:$0xff] }
 0x29f   :  { %v457_v28 = vld [vmem:[%s5123_s4 + $0x38] sm:$0xff]  ;;  %v3345_v30 = vcombine.low %v461_v13, %v465_v14  ;;  %v3336_v31 = vcombine.high %v452_v22, %v456_v25  ;;  %v3335_v37 = vcombine.low %v452_v22, %v456_v25 }
 0x2a0   :  { %v443_v39 = vpack.c.bf16 %v441_v40, %v439_v34  ;;  %v3338_v33 = vcombine.high %v453_v27, %v457_v28  ;;  %v576_v34 = vld [vmem:[%s5123_s4 + $0x3f0] sm:$0xff]  ;;  %v573_v40 = vld [vmem:[%s5123_s4 + $0x3d8] sm:$0xff]  ;;  %v3337_v38 = vcombine.low %v453_v27, %v457_v28 }
 0x2a1   :  { %v3456_v45 = vcombine.high %v572_v36, %v576_v34  ;;  %v3455_v47 = vcombine.low %v572_v36, %v576_v34  ;;  %v3457_v48 = vcombine.low %v573_v40, %v577_v35  ;;  %v541_v3 = vld [vmem:[%s5123_s4 + $0x2d8] sm:$0xff] }
 0x2a2   :  { %1299 = vmatprep.mubr.bf16.mxu0 %v443_v39  ;;  %1342 = vmatprep.mubr.bf16.mxu1 %v443_v39  ;;  %v545_v4 = vld [vmem:[%s5123_s4 + $0x2f8] sm:$0xff] }
 0x2a3   :  { %1300 = vmatmul.mubr.bf16.vlgmr.msra.gmra.mxu0 %v4357_v41  ;;  %1343 = vmatmul.mubr.bf16.vlgmr.msra.gmra.mxu1 %v4357_v41  ;;  %v533_v11 = vld [vmem:[%s5123_s4 + $0x298] sm:$0xff]  ;;  %v3425_v14 = vcombine.low %v541_v3, %v545_v4 }
 0x2a4   :  { %1354 = vmatpush1.bf16.msra.mxu0 %v3391_v7  ;;  %1397 = vmatpush1.bf16.msra.mxu1 %v3393_v8  ;;  %v3359_v7 = vcombine.low %v476_v61, %v480_v18  ;;  %v3361_v8 = vcombine.low %v477_v19, %v481_v21  ;;  %v549_v61 = vld [vmem:[%s5123_s4 + $0x318] sm:$0xff]  ;;  %v3441_v21 = vcombine.low %v557_v53, %v561_v54 }
 0x2a5   :  { %1385 = vmatprep.mubr.bf16.mxu0 %v443_v39  ;;  %1428 = vmatprep.mubr.bf16.mxu1 %v443_v39  ;;  %v3458_v39 = vcombine.high %v573_v40, %v577_v35  ;;  %v553_v18 = vld [vmem:[%s5123_s4 + $0x338] sm:$0xff] }
 0x2a6   :  { %1355 = vmatprep.subr.bf16.mxu0 %v3384_v43  ;;  %1398 = vmatprep.subr.bf16.mxu1 %v3386_v44  ;;  %v568_v43 = vld [vmem:[%s5123_s4 + $0x3b0] sm:$0xff]  ;;  %v565_v44 = vld [vmem:[%s5123_s4 + $0x398] sm:$0xff]  ;;  %v3433_v6 = vcombine.low %v549_v61, %v553_v18 }
 0x2a7   :  { %v3447_v55 = vcombine.low %v564_v42, %v568_v43  ;;  %v3449_v56 = vcombine.low %v565_v44, %v569_v46  ;;  %v537_v12 = vld [vmem:[%s5123_s4 + $0x2b8] sm:$0xff] }
 0x2a8   :  { %1356 = vmatpush1.bf16.msra.mxu0 %v3383_v49  ;;  %1399 = vmatpush1.bf16.msra.mxu1 %v3385_v50  ;;  %v3448_v49 = vcombine.high %v564_v42, %v568_v43  ;;  %v3450_v50 = vcombine.high %v565_v44, %v569_v46  ;;  %v525_v22 = vld [vmem:[%s5123_s4 + $0x258] sm:$0xff]  ;;  %v3417_v28 = vcombine.low %v533_v11, %v537_v12 }
 0x2a9   :  { %1357 = vmatprep.subr.bf16.mxu0 %v3376_v51  ;;  %1400 = vmatprep.subr.bf16.mxu1 %v3378_v52  ;;  %v556_v51 = vld [vmem:[%s5123_s4 + $0x350] sm:$0xff]  ;;  %v529_v25 = vld [vmem:[%s5123_s4 + $0x278] sm:$0xff] }
 0x2aa   :  { %v560_v52 = vld [vmem:[%s5123_s4 + $0x370] sm:$0xff]  ;;  %v517_v36 = vld [vmem:[%s5123_s4 + $0x218] sm:$0xff]  ;;  %v3409_v35 = vcombine.low %v525_v22, %v529_v25 }
 0x2ab   :  { %v3439_v19 = vcombine.low %v556_v51, %v560_v52  ;;  %v521_v34 = vld [vmem:[%s5123_s4 + $0x238] sm:$0xff] }
 0x2ac   :  { %1358 = vmatpush1.bf16.msra.mxu0 %v3375_v57  ;;  %1401 = vmatpush1.bf16.msra.mxu1 %v3377_v58  ;;  %v3440_v57 = vcombine.high %v556_v51, %v560_v52  ;;  %v3442_v58 = vcombine.high %v557_v53, %v561_v54  ;;  %v3825_v42 = vld [vmem:[%s5124_s5 + $0x78] sm:$0xff]   ;;  %v3834_v51 = vld [vmem:[%s5124_s5 + $0xe8] sm:$0xff]   ;;  %v3837_v54 = vld [vmem:[%s5124_s5 + $0x60] sm:$0xff]  }
 0x2ad   :  { %1359 = vmatprep.subr.bf16.mxu0 %v3368_v59  ;;  %1402 = vmatprep.subr.bf16.mxu1 %v3370_v60  ;;  %v548_v59 = vld [vmem:[%s5123_s4 + $0x310] sm:$0xff]  ;;  %v3826_v43 = vld [vmem:[%s5124_s5 + $0xf8] sm:$0xff]   ;;  %v3835_v52 = vld [vmem:[%s5124_s5 + $0x28] sm:$0xff]  }
 0x2ae   :  { %v552_v60 = vld [vmem:[%s5123_s4 + $0x330] sm:$0xff]  ;;  %v3827_v44 = vld [vmem:[%s5124_s5 + $0x38] sm:$0xff]   ;;  %v3836_v53 = vld [vmem:[%s5124_s5 + $0xa8] sm:$0xff]  }
 0x2af   :  { %v3431_v5 = vcombine.low %v548_v59, %v552_v60  ;;  %v3828_v46 = vld [vmem:[%s5124_s5 + $0xb8] sm:$0xff]  }
 0x2b0   :  { %1360 = vmatpush1.bf16.msra.mxu0 %v3367_v62  ;;  %1403 = vmatpush1.bf16.msra.mxu1 %v3369_v63  ;;  %v3432_v62 = vcombine.high %v548_v59, %v552_v60  ;;  %v3434_v63 = vcombine.high %v549_v61, %v553_v18  ;;  %v3842_v59 = vld [vmem:[%s5124_s5 + $0xd8] sm:$0xff]   ;;  %v3845_v18 = vld [vmem:[%s5124_s5 + $0x50] sm:$0xff]  }
 0x2b1   :  { %1361 = vmatprep.subr.bf16.mxu0 %v3360_v0  ;;  %1404 = vmatprep.subr.bf16.mxu1 %v3362_v2  ;;  %v540_v0 = vld [vmem:[%s5123_s4 + $0x2d0] sm:$0xff]  ;;  %v3843_v60 = vld [vmem:[%s5124_s5 + $0x18] sm:$0xff]  }
 0x2b2   :  { %v544_v2 = vld [vmem:[%s5123_s4 + $0x2f0] sm:$0xff]  ;;  %v3844_v61 = vld [vmem:[%s5124_s5 + $0x98] sm:$0xff]  }
 0x2b3   :  { %v3423_v13 = vcombine.low %v540_v0, %v544_v2 }
 0x2b4   :  { %1362 = vmatpush1.bf16.msra.mxu0 %v3359_v7  ;;  %1405 = vmatpush1.bf16.msra.mxu1 %v3361_v8  ;;  %v3424_v7 = vcombine.high %v540_v0, %v544_v2  ;;  %v3426_v8 = vcombine.high %v541_v3, %v545_v4  ;;  %v3850_v0 = vld [vmem:[%s5124_s5 + $0xc8] sm:$0xff]   ;;  %v3853_v4 = vld [vmem:[%s5124_s5 + $0x40] sm:$0xff]  }
 0x2b5   :  { %1363 = vmatprep.subr.bf16.mxu0 %v3352_v9  ;;  %1406 = vmatprep.subr.bf16.mxu1 %v3354_v10  ;;  %v532_v9 = vld [vmem:[%s5123_s4 + $0x290] sm:$0xff]  ;;  %v3851_v2 = vld [vmem:[%s5124_s5 + $0x8] sm:$0xff]  }
 0x2b6   :  { %v536_v10 = vld [vmem:[%s5123_s4 + $0x2b0] sm:$0xff]  ;;  %v3852_v3 = vld [vmem:[%s5124_s5 + $0x88] sm:$0xff]  }
 0x2b7   :  { %v3415_v27 = vcombine.low %v532_v9, %v536_v10 }
 0x2b8   :  { %1364 = vmatpush1.bf16.msra.mxu0 %v3351_v15  ;;  %1407 = vmatpush1.bf16.msra.mxu1 %v3353_v16  ;;  %v3416_v15 = vcombine.high %v532_v9, %v536_v10  ;;  %v3418_v16 = vcombine.high %v533_v11, %v537_v12  ;;  %v3858_v9 = vld [vmem:[%s5124_s5 + $0x1f8] sm:$0xff]  }
 0x2b9   :  { %1365 = vmatprep.subr.bf16.mxu0 %v3344_v17  ;;  %1408 = vmatprep.subr.bf16.mxu1 %v3346_v20  ;;  %v524_v17 = vld [vmem:[%s5123_s4 + $0x250] sm:$0xff] }
 0x2ba   :  { %v528_v20 = vld [vmem:[%s5123_s4 + $0x270] sm:$0xff] }
 0x2bb   :  { %v3407_v40 = vcombine.low %v524_v17, %v528_v20  ;;  %v3329_v10 = vld [vmem:[%s5122_s1 + $0x3] ss:$8 sm:$0xf] }
 0x2bc   :  { %1366 = vmatpush1.bf16.msra.mxu0 %v3343_v29  ;;  %1409 = vmatpush1.bf16.msra.mxu1 %v3345_v30  ;;  %v3408_v29 = vcombine.high %v524_v17, %v528_v20  ;;  %v3410_v30 = vcombine.high %v525_v22, %v529_v25  ;;  %v3330_v11 = vld [vmem:[%s5122_s1 + $0x3] ss:$8 sm:$0xf0] }
 0x2bd   :  { %1367 = vmatprep.subr.bf16.mxu0 %v3336_v31  ;;  %1410 = vmatprep.subr.bf16.mxu1 %v3338_v33  ;;  %v516_v31 = vld [vmem:[%s5123_s4 + $0x210] sm:$0xff]  ;;  %v4639_v12 = vor.u32 %v3330_v11, %v3329_v10 }
 0x2be   :  { %v520_v33 = vld [vmem:[%s5123_s4 + $0x230] sm:$0xff] }
 0x2bf   :  { %v594_v17 = vrot.slane %v4639_v12, %v4077_v26 }
 0x2c0   :  { %1368 = vmatpush1.bf16.msra.mxu0 %v3335_v37  ;;  %1411 = vmatpush1.bf16.msra.mxu1 %v3337_v38  ;;  %v3400_v37 = vcombine.high %v516_v31, %v520_v33  ;;  %v3402_v38 = vcombine.high %v517_v36, %v521_v34 }
 0x2c1   :  { %1369 = vmatprep.subr.bf16.mxu0 %v3456_v45  ;;  %1412 = vmatprep.subr.bf16.mxu1 %v3458_v39  ;;  %v3399_v45 = vcombine.low %v516_v31, %v520_v33  ;;  %v3401_v39 = vcombine.low %v517_v36, %v521_v34 }
 0x2c4   :  { %1370 = vmatpush2.bf16.msra.mxu0 %v3455_v47  ;;  %1413 = vmatpush2.bf16.msra.mxu1 %v3457_v48  ;;  %v3829_v47 = vld [vmem:[%s5124_s5 + $0x70] sm:$0xff]  }
 0x2c5   :  { %1371 = vmatprep.subr.bf16.mxu0 %v3448_v49  ;;  %1414 = vmatprep.subr.bf16.mxu1 %v3450_v50  ;;  %v3830_v48 = vld [vmem:[%s5124_s5 + $0xf0] sm:$0xff]  }
 0x2c6   :  { %v3831_v49 = vld [vmem:[%s5124_s5 + $0x30] sm:$0xff]  }
 0x2c7   :  { %v3832_v50 = vld [vmem:[%s5124_s5 + $0xb0] sm:$0xff]  }
 0x2c8   :  { %1372 = vmatpush2.bf16.msra.mxu0 %v3447_v55  ;;  %1415 = vmatpush2.bf16.msra.mxu1 %v3449_v56  ;;  %v3838_v55 = vld [vmem:[%s5124_s5 + $0xe0] sm:$0xff]  }
 0x2c9   :  { %1373 = vmatprep.subr.bf16.mxu0 %v3440_v57  ;;  %1416 = vmatprep.subr.bf16.mxu1 %v3442_v58  ;;  %v3839_v56 = vld [vmem:[%s5124_s5 + $0x20] sm:$0xff]   ;;  %v3841_v58 = vld [vmem:[%s5124_s5 + $0x58] sm:$0xff]  }
 0x2ca   :  { %v3840_v57 = vld [vmem:[%s5124_s5 + $0xa0] sm:$0xff]  }
 0x2cc   :  { %1374 = vmatpush2.bf16.msra.mxu0 %v3439_v19  ;;  %1417 = vmatpush2.bf16.msra.mxu1 %v3441_v21  ;;  %v3846_v19 = vld [vmem:[%s5124_s5 + $0xd0] sm:$0xff]  }
 0x2cd   :  { %1375 = vmatprep.subr.bf16.mxu0 %v3432_v62  ;;  %1418 = vmatprep.subr.bf16.mxu1 %v3434_v63  ;;  %v3847_v21 = vld [vmem:[%s5124_s5 + $0x10] sm:$0xff]   ;;  %v3849_v63 = vld [vmem:[%s5124_s5 + $0x48] sm:$0xff]  }
 0x2ce   :  { %v3848_v62 = vld [vmem:[%s5124_s5 + $0x90] sm:$0xff]  }
 0x2d0   :  { %1376 = vmatpush2.bf16.msra.mxu0 %v3431_v5  ;;  %1419 = vmatpush2.bf16.msra.mxu1 %v3433_v6  ;;  %v3854_v5 = vld [vmem:[%s5124_s5 + $0xc0] sm:$0xff]  }
 0x2d1   :  { %1377 = vmatprep.subr.bf16.mxu0 %v3424_v7  ;;  %1420 = vmatprep.subr.bf16.mxu1 %v3426_v8  ;;  %v3855_v6 = vld [vmem:[%s5124_s5] sm:$0xff]   ;;  %v3857_v8 = vld [vmem:[%s5124_s5 + $0x178] sm:$0xff]  }
 0x2d2   :  { %v3856_v7 = vld [vmem:[%s5124_s5 + $0x80] sm:$0xff]  }
 0x2d4   :  { %1378 = vmatpush2.bf16.msra.mxu0 %v3423_v13  ;;  %1421 = vmatpush2.bf16.msra.mxu1 %v3425_v14  ;;  %v597_v13 = vsub.s32 2, %v4068_v23  ;;  %v601_v14 = vsub.s32 3, %v4068_v23 }
 0x2d5   :  { %1379 = vmatprep.subr.bf16.mxu0 %v3416_v15  ;;  %1422 = vmatprep.subr.bf16.mxu1 %v3418_v16  ;;  %v590_v15 = vrot.slane %v4639_v12, %v4071_v24 }
 0x2d6   :  { %v598_v16 = vrot.slane %v4639_v12, %v597_v13  ;;  %v602_v20 = vrot.slane %v4639_v12, %v601_v14 }
 0x2d8   :  { %1380 = vmatpush2.bf16.msra.mxu0 %v3415_v27  ;;  %1423 = vmatpush2.bf16.msra.mxu1 %v3417_v28 }
 0x2d9   :  { %1381 = vmatprep.subr.bf16.mxu0 %v3408_v29  ;;  %1424 = vmatprep.subr.bf16.mxu1 %v3410_v30 }
 0x2dc   :  { %1382 = vmatpush2.bf16.msra.mxu0 %v3407_v40  ;;  %1425 = vmatpush2.bf16.msra.mxu1 %v3409_v35 }
 0x2dd   :  { %1383 = vmatprep.subr.bf16.mxu0 %v3400_v37  ;;  %1426 = vmatprep.subr.bf16.mxu1 %v3402_v38 }
 0x2e0   :  { %1384 = vmatpush2.bf16.msra.mxu0 %v3399_v45  ;;  %1427 = vmatpush2.bf16.msra.mxu1 %v3401_v39 }
 0x2e1   :  { %3621 = vmatprep.subr.bf16.mxu0 %v3825_v42  ;;  %3643 = vmatprep.subr.bf16.mxu1 %v3826_v43 }
 0x2e3   :  { %1386 = vmatmul.mubr.bf16.vlgmr.msra.gmra.mxu0 %v4357_v41  ;;  %1429 = vmatmul.mubr.bf16.vlgmr.msra.gmra.mxu1 %v4357_v41  ;;  %v3833_v41 = vld [vmem:[%s5124_s5 + $0x68] sm:$0xff]  }
 0x2e4   :  { %3622 = vmatpush3.bf16.msra.mxu0 %v3827_v44  ;;  %3644 = vmatpush3.bf16.msra.mxu1 %v3828_v46 }
 0x2e5   :  { %3623 = vmatprep.subr.bf16.mxu0 %v3829_v47  ;;  %3645 = vmatprep.subr.bf16.mxu1 %v3830_v48 }
 0x2e8   :  { %3624 = vmatpush3.bf16.msra.mxu0 %v3831_v49  ;;  %3646 = vmatpush3.bf16.msra.mxu1 %v3832_v50 }
 0x2e9   :  { %3625 = vmatprep.subr.bf16.mxu0 %v3833_v41  ;;  %3647 = vmatprep.subr.bf16.mxu1 %v3834_v51 }
 0x2ec   :  { %3626 = vmatpush3.bf16.msra.mxu0 %v3835_v52  ;;  %3648 = vmatpush3.bf16.msra.mxu1 %v3836_v53 }
 0x2ed   :  { %3627 = vmatprep.subr.bf16.mxu0 %v3837_v54  ;;  %3649 = vmatprep.subr.bf16.mxu1 %v3838_v55 }
 0x2f0   :  { %3628 = vmatpush3.bf16.msra.mxu0 %v3839_v56  ;;  %3650 = vmatpush3.bf16.msra.mxu1 %v3840_v57 }
 0x2f1   :  { %3629 = vmatprep.subr.bf16.mxu0 %v3841_v58  ;;  %3651 = vmatprep.subr.bf16.mxu1 %v3842_v59 }
 0x2f4   :  { %3630 = vmatpush3.bf16.msra.mxu0 %v3843_v60  ;;  %3652 = vmatpush3.bf16.msra.mxu1 %v3844_v61 }
 0x2f5   :  { %3631 = vmatprep.subr.bf16.mxu0 %v3845_v18  ;;  %3653 = vmatprep.subr.bf16.mxu1 %v3846_v19 }
 0x2f8   :  { %3632 = vmatpush3.bf16.msra.mxu0 %v3847_v21  ;;  %3654 = vmatpush3.bf16.msra.mxu1 %v3848_v62 }
 0x2f9   :  { %3633 = vmatprep.subr.bf16.mxu0 %v3849_v63  ;;  %3655 = vmatprep.subr.bf16.mxu1 %v3850_v0 }
 0x2fc   :  { %3634 = vmatpush3.bf16.msra.mxu0 %v3851_v2  ;;  %3656 = vmatpush3.bf16.msra.mxu1 %v3852_v3 }
 0x2fd   :  { %3635 = vmatprep.subr.bf16.mxu0 %v3853_v4  ;;  %3657 = vmatprep.subr.bf16.mxu1 %v3854_v5 }
 0x300   :  { %3636 = vmatpush3.bf16.msra.mxu0 %v3855_v6  ;;  %3658 = vmatpush3.bf16.msra.mxu1 %v3856_v7 }
 0x301   :  { %3665 = vmatprep.subr.bf16.mxu0 %v3857_v8  ;;  %3687 = vmatprep.subr.bf16.mxu1 %v3858_v9 }
 0x363   :  { %v1301_v22 = vpop.f32.mrf.mxu0  ;;  %v1344_v25 = vpop.f32.mrf.mxu1 }
 0x364   :  { %v1302_v27 = vadd.f32 %v1301_v22, %v590_v15  ;;  %v1345_v28 = vadd.f32 %v1344_v25, %v598_v16 }
 0x365   :  { %v1303_v29 = vpop.f32.mrf.mxu0  ;;  %v1346_v30 = vpop.f32.mrf.mxu1 }
 0x366   :  { %v1304_v31 = vadd.f32 %v1303_v29, %v594_v17  ;;  %v1347_v33 = vadd.f32 %v1346_v30, %v602_v20  ;;  %v4650_v36 = vmul.f32 %v4082_v32, %v1302_v27  ;;  %v4653_v34 = vmul.f32 %v4082_v32, %v1345_v28 }
 0x367   :  { %v1305_v40 = vpop.f32.mrf.mxu0  ;;  %v1348_v35 = vpop.f32.mrf.mxu1 }
 0x368   :  { %v4656_v37 = vmul.f32 %v4082_v32, %v1304_v31  ;;  %v4659_v38 = vmul.f32 %v4082_v32, %v1347_v33  ;;  %v1306_v45 = vadd.f32 %v1305_v40, %v590_v15  ;;  %v1349_v39 = vadd.f32 %v1348_v35, %v598_v16 }
 0x369   :  { %v1307_v42 = vpop.f32.mrf.mxu0  ;;  %v1350_v43 = vpop.f32.mrf.mxu1  ;;  %v1511_v47 = vmul.f32 %v4650_v36, %v4650_v36  ;;  %v1513_v48 = vmul.f32 %v4653_v34, %v4653_v34 }
 0x36a   :  { %v1308_v44 = vadd.f32 %v1307_v42, %v594_v17  ;;  %v1351_v46 = vadd.f32 %v1350_v43, %v602_v20  ;;  %v4665_v49 = vmul.f32 0.0, %v1306_v45  ;;  %v4667_v50 = vmul.f32 0.0, %v1349_v39 }
 0x36b   :  { %v1512_v41 = vmul.f32 %v4656_v37, %v4656_v37  ;;  %v1514_v51 = vmul.f32 %v4659_v38, %v4659_v38 }
 0x36c   :  { %v4673_v52 = vmul.f32 0.0, %v1308_v44  ;;  %v4675_v53 = vmul.f32 0.0, %v1351_v46  ;;  %v1455_v54 = vadd.f32 %v4665_v49, %v4650_v36  ;;  %v1519_v55 = vmul.f32 %v4665_v49, %v4665_v49 }
 0x36d   :  { %v1469_v56 = vadd.f32 %v4667_v50, %v4653_v34  ;;  %v1521_v57 = vmul.f32 %v4667_v50, %v4667_v50 }
 0x36e   :  { %v1462_v58 = vadd.f32 %v4673_v52, %v4656_v37  ;;  %v1520_v59 = vmul.f32 %v4673_v52, %v4673_v52  ;;  %v1476_v60 = vadd.f32 %v4675_v53, %v4659_v38  ;;  %v1522_v61 = vmul.f32 %v4675_v53, %v4675_v53 }
 0x36f   :  { %v1456_v18 = vrot.slane %v1455_v54, 4  ;;  %v1527_v19 = vadd.f32 %v1519_v55, %v1511_v47  ;;  %v1470_v21 = vrot.slane %v1469_v56, 4  ;;  %v1541_v62 = vadd.f32 %v1521_v57, %v1513_v48 }
 0x370   :  { %v1463_v63 = vrot.slane %v1462_v58, 4  ;;  %v1534_v0 = vadd.f32 %v1520_v59, %v1512_v41  ;;  %v1477_v2 = vrot.slane %v1476_v60, 4  ;;  %v1548_v3 = vadd.f32 %v1522_v61, %v1514_v51 }
 0x371   :  { %v1457_v4 = vadd.f32 %v1456_v18, %v1455_v54  ;;  %v1528_v5 = vrot.slane %v1527_v19, 4  ;;  %v1471_v6 = vadd.f32 %v1470_v21, %v1469_v56  ;;  %v1542_v7 = vrot.slane %v1541_v62, 4 }
 0x372   :  { %v1464_v8 = vadd.f32 %v1463_v63, %v1462_v58  ;;  %v1535_v9 = vrot.slane %v1534_v0, 4  ;;  %v1478_v10 = vadd.f32 %v1477_v2, %v1476_v60  ;;  %v1549_v11 = vrot.slane %v1548_v3, 4 }
 0x373   :  { %v1458_v13 = vrot.slane %v1457_v4, 2  ;;  %v1529_v14 = vadd.f32 %v1528_v5, %v1527_v19  ;;  %v1472_v15 = vrot.slane %v1471_v6, 2  ;;  %v1543_v16 = vadd.f32 %v1542_v7, %v1541_v62  ;;  %v3860_v5 = vld [vmem:[%s5124_s5 + $0x1b8] sm:$0xff]  }
 0x374   :  { %v1465_v17 = vrot.slane %v1464_v8, 2  ;;  %v1536_v20 = vadd.f32 %v1535_v9, %v1534_v0  ;;  %v1479_v22 = vrot.slane %v1478_v10, 2  ;;  %v1550_v25 = vadd.f32 %v1549_v11, %v1548_v3  ;;  %v3862_v9 = vld [vmem:[%s5124_s5 + $0x1f0] sm:$0xff]  }
 0x375   :  { %v1459_v27 = vadd.f32 %v1458_v13, %v1457_v4  ;;  %v1530_v28 = vrot.slane %v1529_v14, 2  ;;  %v1473_v29 = vadd.f32 %v1472_v15, %v1471_v6  ;;  %v1544_v30 = vrot.slane %v1543_v16, 2  ;;  %v3859_v4 = vld [vmem:[%s5124_s5 + $0x138] sm:$0xff]   ;;  %v3864_v11 = vld [vmem:[%s5124_s5 + $0x1b0] sm:$0xff]   ;;  %v3865_v13 = vld [vmem:[%s5124_s5 + $0x168] sm:$0xff]  }
 0x376   :  { %v1466_v31 = vadd.f32 %v1465_v17, %v1464_v8  ;;  %v1537_v33 = vrot.slane %v1536_v20, 2  ;;  %v1480_v40 = vadd.f32 %v1479_v22, %v1478_v10  ;;  %v1551_v35 = vrot.slane %v1550_v25, 2  ;;  %v3861_v8 = vld [vmem:[%s5124_s5 + $0x170] sm:$0xff]   ;;  %v3867_v15 = vld [vmem:[%s5124_s5 + $0x128] sm:$0xff]   ;;  %v3869_v17 = vld [vmem:[%s5124_s5 + $0x160] sm:$0xff]  }
 0x377   :  { %v1460_v45 = vrot.slane %v1459_v27, 1  ;;  %v1531_v39 = vadd.f32 %v1530_v28, %v1529_v14  ;;  %v1474_v42 = vrot.slane %v1473_v29, 1  ;;  %v1545_v43 = vadd.f32 %v1544_v30, %v1543_v16  ;;  %v3863_v10 = vld [vmem:[%s5124_s5 + $0x130] sm:$0xff]   ;;  %v3866_v14 = vld [vmem:[%s5124_s5 + $0x1e8] sm:$0xff]   ;;  %v3871_v22 = vld [vmem:[%s5124_s5 + $0x120] sm:$0xff]  }
 0x378   :  { %v1467_v44 = vrot.slane %v1466_v31, 1  ;;  %v1538_v46 = vadd.f32 %v1537_v33, %v1536_v20  ;;  %v1481_v47 = vrot.slane %v1480_v40, 1  ;;  %v1552_v48 = vadd.f32 %v1551_v35, %v1550_v25  ;;  %v3868_v16 = vld [vmem:[%s5124_s5 + $0x1a8] sm:$0xff]   ;;  %v3870_v20 = vld [vmem:[%s5124_s5 + $0x1e0] sm:$0xff]   ;;  %v3874_v28 = vld [vmem:[%s5124_s5 + $0x1d8] sm:$0xff]  }
 0x379   :  { %v1532_v41 = vrot.slane %v1531_v39, 1  ;;  %v1546_v51 = vrot.slane %v1545_v43, 1  ;;  %v1461_v56 = vadd.f32 %v1460_v45, %v1459_v27  ;;  %v1475_v57 = vadd.f32 %v1474_v42, %v1473_v29  ;;  %v3872_v25 = vld [vmem:[%s5124_s5 + $0x1a0] sm:$0xff]   ;;  %v3873_v27 = vld [vmem:[%s5124_s5 + $0x158] sm:$0xff]   ;;  %v3878_v33 = vld [vmem:[%s5124_s5 + $0x1d0] sm:$0xff]  }
 0x37a   :  { %v1539_v54 = vrot.slane %v1538_v46, 1  ;;  %v1553_v55 = vrot.slane %v1552_v48, 1  ;;  %v1468_v60 = vadd.f32 %v1467_v44, %v1466_v31  ;;  %v1482_v18 = vadd.f32 %v1481_v47, %v1480_v40  ;;  %v3875_v29 = vld [vmem:[%s5124_s5 + $0x118] sm:$0xff]   ;;  %v3877_v31 = vld [vmem:[%s5124_s5 + $0x150] sm:$0xff]   ;;  %v3881_v45 = vld [vmem:[%s5124_s5 + $0x148] sm:$0xff]  }
 0x37b   :  { %v1533_v58 = vadd.f32 %v1532_v41, %v1531_v39  ;;  %v1547_v59 = vadd.f32 %v1546_v51, %v1545_v43  ;;  %v3876_v30 = vld [vmem:[%s5124_s5 + $0x198] sm:$0xff]   ;;  %v3879_v40 = vld [vmem:[%s5124_s5 + $0x110] sm:$0xff]   ;;  %v3882_v39 = vld [vmem:[%s5124_s5 + $0x1c8] sm:$0xff]   ;;  %v605_v41 = vsub.s32 4, %v4068_v23  ;;  %v613_v51 = vsub.s32 6, %v4068_v23 }
 0x37c   :  { %v1540_v61 = vadd.f32 %v1539_v54, %v1538_v46  ;;  %v1554_v19 = vadd.f32 %v1553_v55, %v1552_v48  ;;  %v3880_v35 = vld [vmem:[%s5124_s5 + $0x190] sm:$0xff]   ;;  %v3883_v42 = vld [vmem:[%s5124_s5 + $0x108] sm:$0xff]   ;;  %v3885_v44 = vld [vmem:[%s5124_s5 + $0x140] sm:$0xff]   ;;  %v609_v54 = vsub.s32 5, %v4068_v23  ;;  %v617_v55 = vsub.s32 7, %v4068_v23 }
 0x37d   :  { %v1583_v21 = vsel %vm166_vm2, %v1461_v56, %v1533_v58  ;;  %v1585_v62 = vsel %vm166_vm2, %v1475_v57, %v1547_v59  ;;  %v3884_v43 = vld [vmem:[%s5124_s5 + $0x188] sm:$0xff]   ;;  %v3886_v46 = vld [vmem:[%s5124_s5 + $0x1c0] sm:$0xff]   ;;  %v606_v56 = vrot.slane %v4639_v12, %v605_v41  ;;  %v614_v57 = vrot.slane %v4639_v12, %v613_v51 }
 0x37e   :  { %v1584_v63 = vsel %vm166_vm2, %v1468_v60, %v1540_v61  ;;  %v1586_v0 = vsel %vm166_vm2, %v1482_v18, %v1554_v19  ;;  %v1591_v6 = vpack.c.bf16 %v1583_v21, %v1583_v21  ;;  %v1593_v7 = vpack.c.bf16 %v1585_v62, %v1585_v62  ;;  %v3887_v47 = vld [vmem:[%s5124_s5 + $0x100] sm:$0xff]  }
 0x37f   :  { %v1592_v2 = vpack.c.bf16 %v1584_v63, %v1584_v63  ;;  %v1594_v3 = vpack.c.bf16 %v1586_v0, %v1586_v0  ;;  %v3888_v48 = vld [vmem:[%s5124_s5 + $0x180] sm:$0xff]   ;;  %v610_v58 = vrot.slane %v4639_v12, %v609_v54  ;;  %v618_v59 = vrot.slane %v4639_v12, %v617_v55 }
 0x381   :  { %2143 = vmatprep.mubr.bf16.mxu0 %v1592_v2  ;;  %2183 = vmatprep.mubr.bf16.mxu1 %v1594_v3 }
 0x382   :  { %2144 = vmatmul.mubr.bf16.vlgmr.msra.gmra.mxu0 %v1591_v6  ;;  %2184 = vmatmul.mubr.bf16.vlgmr.msra.gmra.mxu1 %v1593_v7 }
 0x383   :  { %3666 = vmatpush3.bf16.msra.mxu0 %v3859_v4  ;;  %3688 = vmatpush3.bf16.msra.mxu1 %v3860_v5 }
 0x384   :  { %3667 = vmatprep.subr.bf16.mxu0 %v3861_v8  ;;  %3689 = vmatprep.subr.bf16.mxu1 %v3862_v9 }
 0x387   :  { %3668 = vmatpush3.bf16.msra.mxu0 %v3863_v10  ;;  %3690 = vmatpush3.bf16.msra.mxu1 %v3864_v11 }
 0x388   :  { %3669 = vmatprep.subr.bf16.mxu0 %v3865_v13  ;;  %3691 = vmatprep.subr.bf16.mxu1 %v3866_v14 }
 0x38b   :  { %3670 = vmatpush3.bf16.msra.mxu0 %v3867_v15  ;;  %3692 = vmatpush3.bf16.msra.mxu1 %v3868_v16 }
 0x38c   :  { %3671 = vmatprep.subr.bf16.mxu0 %v3869_v17  ;;  %3693 = vmatprep.subr.bf16.mxu1 %v3870_v20 }
 0x38f   :  { %3672 = vmatpush3.bf16.msra.mxu0 %v3871_v22  ;;  %3694 = vmatpush3.bf16.msra.mxu1 %v3872_v25 }
 0x390   :  { %3673 = vmatprep.subr.bf16.mxu0 %v3873_v27  ;;  %3695 = vmatprep.subr.bf16.mxu1 %v3874_v28 }
 0x393   :  { %3674 = vmatpush3.bf16.msra.mxu0 %v3875_v29  ;;  %3696 = vmatpush3.bf16.msra.mxu1 %v3876_v30 }
 0x394   :  { %3675 = vmatprep.subr.bf16.mxu0 %v3877_v31  ;;  %3697 = vmatprep.subr.bf16.mxu1 %v3878_v33 }
 0x397   :  { %3676 = vmatpush3.bf16.msra.mxu0 %v3879_v40  ;;  %3698 = vmatpush3.bf16.msra.mxu1 %v3880_v35 }
 0x398   :  { %3677 = vmatprep.subr.bf16.mxu0 %v3881_v45  ;;  %3699 = vmatprep.subr.bf16.mxu1 %v3882_v39 }
 0x39b   :  { %3678 = vmatpush3.bf16.msra.mxu0 %v3883_v42  ;;  %3700 = vmatpush3.bf16.msra.mxu1 %v3884_v43 }
 0x39c   :  { %3679 = vmatprep.subr.bf16.mxu0 %v3885_v44  ;;  %3701 = vmatprep.subr.bf16.mxu1 %v3886_v46 }
 0x39f   :  { %3680 = vmatpush3.bf16.msra.mxu0 %v3887_v47  ;;  %3702 = vmatpush3.bf16.msra.mxu1 %v3888_v48 }
 0x3a3   :  { %v1387_v60 = vpop.f32.mrf.mxu0  ;;  %v1430_v61 = vpop.f32.mrf.mxu1 }
 0x3a4   :  { %v1388_v18 = vadd.f32 %v1387_v60, %v606_v56  ;;  %v1431_v19 = vadd.f32 %v1430_v61, %v614_v57 }
 0x3a5   :  { %v1389_v21 = vpop.f32.mrf.mxu0  ;;  %v1432_v62 = vpop.f32.mrf.mxu1 }
 0x3a6   :  { %v1390_v63 = vadd.f32 %v1389_v21, %v610_v58  ;;  %v1433_v0 = vadd.f32 %v1432_v62, %v618_v59  ;;  %v4796_v23 = vmul.f32 %v4082_v32, %v1388_v18  ;;  %v4799_v2 = vmul.f32 %v4082_v32, %v1431_v19 }
 0x3a7   :  { %v1391_v3 = vpop.f32.mrf.mxu0  ;;  %v1434_v4 = vpop.f32.mrf.mxu1 }
 0x3a8   :  { %v4802_v5 = vmul.f32 %v4082_v32, %v1390_v63  ;;  %v4805_v12 = vmul.f32 %v4082_v32, %v1433_v0  ;;  %v1392_v6 = vadd.f32 %v1391_v3, %v606_v56  ;;  %v1435_v7 = vadd.f32 %v1434_v4, %v614_v57 }
 0x3a9   :  { %v1393_v8 = vpop.f32.mrf.mxu0  ;;  %v1436_v9 = vpop.f32.mrf.mxu1  ;;  %v1515_v13 = vmul.f32 %v4796_v23, %v4796_v23  ;;  %v1517_v14 = vmul.f32 %v4799_v2, %v4799_v2 }
 0x3aa   :  { %v1394_v10 = vadd.f32 %v1393_v8, %v610_v58  ;;  %v1437_v11 = vadd.f32 %v1436_v9, %v618_v59  ;;  %v4811_v15 = vmul.f32 0.0, %v1392_v6  ;;  %v4813_v16 = vmul.f32 0.0, %v1435_v7 }
 0x3ab   :  { %v1516_v32 = vmul.f32 %v4802_v5, %v4802_v5  ;;  %v1518_v17 = vmul.f32 %v4805_v12, %v4805_v12 }
 0x3ac   :  { %v4819_v20 = vmul.f32 0.0, %v1394_v10  ;;  %v4821_v22 = vmul.f32 0.0, %v1437_v11  ;;  %v1483_v25 = vadd.f32 %v4811_v15, %v4796_v23  ;;  %v1523_v27 = vmul.f32 %v4811_v15, %v4811_v15 }
 0x3ad   :  { %v1497_v28 = vadd.f32 %v4813_v16, %v4799_v2  ;;  %v1525_v29 = vmul.f32 %v4813_v16, %v4813_v16 }
 0x3ae   :  { %v1490_v30 = vadd.f32 %v4819_v20, %v4802_v5  ;;  %v1524_v31 = vmul.f32 %v4819_v20, %v4819_v20  ;;  %v1504_v33 = vadd.f32 %v4821_v22, %v4805_v12  ;;  %v1526_v40 = vmul.f32 %v4821_v22, %v4821_v22 }
 0x3af   :  { %v1484_v35 = vrot.slane %v1483_v25, 4  ;;  %v1555_v45 = vadd.f32 %v1523_v27, %v1515_v13  ;;  %v1498_v39 = vrot.slane %v1497_v28, 4  ;;  %v1569_v42 = vadd.f32 %v1525_v29, %v1517_v14 }
 0x3b0   :  { %v1491_v43 = vrot.slane %v1490_v30, 4  ;;  %v1562_v44 = vadd.f32 %v1524_v31, %v1516_v32  ;;  %v1505_v46 = vrot.slane %v1504_v33, 4  ;;  %v1576_v47 = vadd.f32 %v1526_v40, %v1518_v17 }
 0x3b1   :  { %v1485_v48 = vadd.f32 %v1484_v35, %v1483_v25  ;;  %v1556_v41 = vrot.slane %v1555_v45, 4  ;;  %v1499_v51 = vadd.f32 %v1498_v39, %v1497_v28  ;;  %v1570_v54 = vrot.slane %v1569_v42, 4 }
 0x3b2   :  { %v1492_v55 = vadd.f32 %v1491_v43, %v1490_v30  ;;  %v1563_v56 = vrot.slane %v1562_v44, 4  ;;  %v1506_v57 = vadd.f32 %v1505_v46, %v1504_v33  ;;  %v1577_v58 = vrot.slane %v1576_v47, 4 }
 0x3b3   :  { %v1486_v59 = vrot.slane %v1485_v48, 2  ;;  %v1557_v60 = vadd.f32 %v1556_v41, %v1555_v45  ;;  %v1500_v61 = vrot.slane %v1499_v51, 2  ;;  %v1571_v18 = vadd.f32 %v1570_v54, %v1569_v42 }
 0x3b4   :  { %v1493_v19 = vrot.slane %v1492_v55, 2  ;;  %v1564_v21 = vadd.f32 %v1563_v56, %v1562_v44  ;;  %v1507_v62 = vrot.slane %v1506_v57, 2  ;;  %v1578_v63 = vadd.f32 %v1577_v58, %v1576_v47  ;;  %v578_v58 = vld [vmem:[%s5123_s4 + $0x400] sm:$0xff] }
 0x3b5   :  { %v1487_v0 = vadd.f32 %v1486_v59, %v1485_v48  ;;  %v1558_v3 = vrot.slane %v1557_v60, 2  ;;  %v1501_v4 = vadd.f32 %v1500_v61, %v1499_v51  ;;  %v1572_v6 = vrot.slane %v1571_v18, 2  ;;  %v582_v59 = vld [vmem:[%s5123_s4 + $0x420] sm:$0xff] }
 0x3b6   :  { %v1494_v7 = vadd.f32 %v1493_v19, %v1492_v55  ;;  %v1565_v8 = vrot.slane %v1564_v21, 2  ;;  %v1508_v9 = vadd.f32 %v1507_v62, %v1506_v57  ;;  %v1579_v10 = vrot.slane %v1578_v63, 2  ;;  %v585_v19 = vld [vmem:[%s5123_s4 + $0x438] sm:$0xff]  ;;  %v583_v62 = vld [vmem:[%s5123_s4 + $0x428] sm:$0xff] }
 0x3b7   :  { %v1488_v11 = vrot.slane %v1487_v0, 1  ;;  %v1559_v13 = vadd.f32 %v1558_v3, %v1557_v60  ;;  %v1502_v14 = vrot.slane %v1501_v4, 1  ;;  %v1573_v32 = vadd.f32 %v1572_v6, %v1571_v18  ;;  %v581_v60 = vld [vmem:[%s5123_s4 + $0x418] sm:$0xff] }
 0x3b8   :  { %v1495_v17 = vrot.slane %v1494_v7, 1  ;;  %v1566_v25 = vadd.f32 %v1565_v8, %v1564_v21  ;;  %v1509_v27 = vrot.slane %v1508_v9, 1  ;;  %v1580_v28 = vadd.f32 %v1579_v10, %v1578_v63  ;;  %v579_v21 = vld [vmem:[%s5123_s4 + $0x408] sm:$0xff] }
 0x3b9   :  { %v1560_v29 = vrot.slane %v1559_v13, 1  ;;  %v1574_v30 = vrot.slane %v1573_v32, 1  ;;  %v1489_v40 = vadd.f32 %v1488_v11, %v1487_v0  ;;  %v1503_v35 = vadd.f32 %v1502_v14, %v1501_v4 }
 0x3ba   :  { %v1567_v31 = vrot.slane %v1566_v25, 1  ;;  %v1581_v33 = vrot.slane %v1580_v28, 1  ;;  %v1496_v42 = vadd.f32 %v1495_v17, %v1494_v7  ;;  %v1510_v44 = vadd.f32 %v1509_v27, %v1508_v9  ;;  %v3894_v27 = vld [vmem:[%s5125_s6 + $0xf8] sm:$0xff]  }
 0x3bb   :  { %v1561_v45 = vadd.f32 %v1560_v29, %v1559_v13  ;;  %v1575_v39 = vadd.f32 %v1574_v30, %v1573_v32  ;;  %v3523_v61 = vcombine.low %v578_v58, %v582_v59  ;;  %v3524_v18 = vcombine.high %v578_v58, %v582_v59  ;;  %v449_v59 = vld [vmem:[%s5122_s1 + $0x5] ss:$0 sm:$0xff] }
 0x3bc   :  { %v1568_v43 = vadd.f32 %v1567_v31, %v1566_v25  ;;  %v1582_v46 = vadd.f32 %v1581_v33, %v1580_v28  ;;  %v3529_v63 = vcombine.low %v581_v60, %v585_v19  ;;  %v3530_v0 = vcombine.high %v581_v60, %v585_v19  ;;  %v580_v19 = vld [vmem:[%s5123_s4 + $0x410] sm:$0xff] }
 0x3bd   :  { %v1587_v47 = vsel %vm166_vm2, %v1489_v40, %v1561_v45  ;;  %v1589_v48 = vsel %vm166_vm2, %v1503_v35, %v1575_v39  ;;  %v3525_v3 = vcombine.low %v579_v21, %v583_v62  ;;  %v3526_v4 = vcombine.high %v579_v21, %v583_v62  ;;  %2348 = vmatprep.subr.bf16.mxu0 %v3524_v18  ;;  %v584_v21 = vld [vmem:[%s5123_s4 + $0x430] sm:$0xff] }
 0x3be   :  { %v1588_v41 = vsel %vm166_vm2, %v1496_v42, %v1568_v43  ;;  %v1590_v51 = vsel %vm166_vm2, %v1510_v44, %v1582_v46  ;;  %v1595_v56 = vpack.c.bf16 %v1587_v47, %v1587_v47  ;;  %v1597_v57 = vpack.c.bf16 %v1589_v48, %v1589_v48  ;;  %2471 = vmatprep.subr.bf16.mxu1 %v3530_v0 }
 0x3bf   :  { %v1596_v54 = vpack.c.bf16 %v1588_v41, %v1588_v41  ;;  %v1598_v55 = vpack.c.bf16 %v1590_v51, %v1590_v51  ;;  %v3528_v0 = vcombine.high %v580_v19, %v584_v21 }
 0x3c1   :  { %2223 = vmatprep.mubr.bf16.mxu0 %v1596_v54  ;;  %2263 = vmatprep.mubr.bf16.mxu1 %v1598_v55  ;;  %v448_v55 = vld [vmem:[%s5122_s1 + $0x4] ss:$0 sm:$0xff] }
 0x3c2   :  { %2224 = vmatmul.mubr.bf16.vlgmr.msra.gmra.mxu0 %v1595_v56  ;;  %2264 = vmatmul.mubr.bf16.vlgmr.msra.gmra.mxu1 %v1597_v57 }
 0x3c3   :  { %2366 = vmatprep.mubr.bf16.mxu0 %v3961_v1  ;;  %2489 = vmatprep.mubr.bf16.mxu1 %v3961_v1 }
 0x3c4   :  { %2349 = vmatpush1.bf16.msra.mxu0 %v3523_v61  ;;  %2472 = vmatpush1.bf16.msra.mxu1 %v3529_v63 }
 0x3c5   :  { %2389 = vmatprep.subr.bf16.mxu0 %v3526_v4  ;;  %3731 = vmatprep.subr.bf16.mxu1 %v3894_v27  ;;  %v3896_v4 = vld [vmem:[%s5125_s6 + $0xb8] sm:$0xff]  }
 0x3c6   :  { %v3901_v27 = vld [vmem:[%s5125_s6 + $0x58] sm:$0xff]  }
 0x442   :  { %v3637_v6 = vpop.f32.mrf.mxu0  ;;  %v3659_v7 = vpop.f32.mrf.mxu1 }
 0x444   :  { %v3638_v8 = vpop.f32.mrf.mxu0  ;;  %v3660_v9 = vpop.f32.mrf.mxu1 }
 0x445   :  { %v3639_v10 = vadd.f32 %v3638_v8, %v3637_v6  ;;  %v3661_v11 = vadd.f32 %v3660_v9, %v3659_v7  ;;  %v3898_v6 = vld [vmem:[%s5125_s6 + $0xf0] sm:$0xff]   ;;  %v3902_v8 = vld [vmem:[%s5125_s6 + $0xe8] sm:$0xff]   ;;  %v3527_v9 = vcombine.low %v580_v19, %v584_v21 }
 0x446   :  { %v3640_v13 = vpop.f32.mrf.mxu0  ;;  %v3662_v14 = vpop.f32.mrf.mxu1  ;;  %v3900_v7 = vld [vmem:[%s5125_s6 + $0xb0] sm:$0xff]  }
 0x447   :  { %v2186_v32 = vadd.f32 %v3661_v11, %v3639_v10  ;;  %v3889_v10 = vld [vmem:[%s5125_s6 + $0x78] sm:$0xff]   ;;  %v3891_v13 = vld [vmem:[%s5125_s6 + $0x70] sm:$0xff]  }
 0x448   :  { %v3641_v17 = vpop.f32.mrf.mxu0  ;;  %v3663_v25 = vpop.f32.mrf.mxu1  ;;  %v3890_v11 = vld [vmem:[%s5125_s6 + $0x38] sm:$0xff]   ;;  %v3892_v14 = vld [vmem:[%s5125_s6 + $0x30] sm:$0xff]  }
 0x449   :  { %v3897_v17 = vld [vmem:[%s5125_s6 + $0x60] sm:$0xff]  }
 0x44a   :  { %v3899_v25 = vld [vmem:[%s5125_s6 + $0x20] sm:$0xff]  }
 0x482   :  { %v3681_v28 = vpop.f32.mrf.mxu0  ;;  %v3703_v29 = vpop.f32.mrf.mxu1 }
 0x484   :  { %v3682_v30 = vpop.f32.mrf.mxu0  ;;  %v3704_v31 = vpop.f32.mrf.mxu1 }
 0x485   :  { %v3683_v33 = vadd.f32 %v3682_v30, %v3681_v28  ;;  %v3705_v39 = vadd.f32 %v3704_v31, %v3703_v29  ;;  %v3903_v28 = vld [vmem:[%s5125_s6 + $0x18] sm:$0xff]   ;;  %v3905_v29 = vld [vmem:[%s5125_s6 + $0x50] sm:$0xff]   ;;  %v3906_v30 = vld [vmem:[%s5125_s6 + $0xe0] sm:$0xff]  }
 0x486   :  { %v3684_v40 = vpop.f32.mrf.mxu0  ;;  %v3706_v35 = vpop.f32.mrf.mxu1  ;;  %v3907_v31 = vld [vmem:[%s5125_s6 + $0x10] sm:$0xff]  }
 0x487   :  { %v2226_v45 = vadd.f32 %v3683_v33, %v2186_v32  ;;  %v3895_v32 = vld [vmem:[%s5125_s6 + $0x28] sm:$0xff]   ;;  %v3908_v33 = vld [vmem:[%s5125_s6 + $0xa0] sm:$0xff]   ;;  %v3910_v35 = vld [vmem:[%s5125_s6 + $0xd8] sm:$0xff]  }
 0x488   :  { %v3685_v42 = vpop.f32.mrf.mxu0  ;;  %v3707_v43 = vpop.f32.mrf.mxu1  ;;  %v3909_v40 = vld [vmem:[%s5125_s6 + $0x48] sm:$0xff]  }
 0x489   :  { %v2266_v44 = vadd.f32 %v3705_v39, %v2226_v45  ;;  %v3911_v45 = vld [vmem:[%s5125_s6 + $0x8] sm:$0xff]   ;;  %v3912_v39 = vld [vmem:[%s5125_s6 + $0x98] sm:$0xff]   ;;  %v3913_v42 = vld [vmem:[%s5125_s6 + $0x40] sm:$0xff]  }
 0x48a   :  { %v3914_v43 = vld [vmem:[%s5125_s6 + $0xd0] sm:$0xff]  }
 0x48b   :  { %v2271_v46 = vmul.f32 0.0078125, %v2266_v44  ;;  %v3915_v44 = vld [vmem:[%s5125_s6] sm:$0xff]  }
 0x48d   :  { %v2272_v47 = vmul.f32 %v2271_v46, %v2271_v46 }
 0x48f   :  { %v2274_v48 = vrot.slane %v2272_v47, 7  ;;  %v3917_v47 = vld [vmem:[%s5125_s6 + $0xc8] sm:$0xff]  }
 0x491   :  { %v2276_v41 = vsub.f32 %v2271_v46, %v2274_v48  ;;  %v3918_v48 = vld [vmem:[%s5125_s6 + $0x178] sm:$0xff]  }
 0x493   :  { %v2277_v51 = vmax.f32 %v2276_v41, 0.0  ;;  %v3919_v41 = vld [vmem:[%s5125_s6 + $0x88] sm:$0xff]  }
 0x495   :  { %v2278_v54 = vadd.f32 1e-05, %v2277_v51  ;;  %v3921_v51 = vld [vmem:[%s5125_s6 + $0xc0] sm:$0xff]  }
 0x497   :  { %3955 = vrsqrt.f32 %v2278_v54  ;;  %v3923_v54 = vld [vmem:[%s5125_s6 + $0x80] sm:$0xff]  }
 0x4a4   :  { %v3956_v56 = vpop.eup %3955 }
 0x4a5   :  { %v2280_v57 = vmul.f32 %v3956_v56, %v448_v55  ;;  %v3926_v55 = vld [vmem:[%s5125_s6 + $0x1f8] sm:$0xff]  }
 0x4a7   :  { %v2282_v58 = vrot.slane %v2280_v57, 1 }
 0x4a9   :  { %v2284_v60 = vmul.f32 %v2282_v58, %v2271_v46  ;;  %v3916_v46 = vld [vmem:[%s5125_s6 + $0x90] sm:$0xff]  }
 0x4ab   :  { %v2285_v61 = vsub.f32 %v449_v59, %v2284_v60 }
 0x4ad   :  { %v2287_v18 = vrot.slane %v2285_v61, 7 }
 0x4af   :  { %v2289_v62 = vsel %vm166_vm2, %v2282_v58, %v2287_v18 }
 0x4b0   :  { %v2290_v63 = vpack.c.bf16 %v2289_v62, %v2289_v62 }
 0x4b2   :  { %3531 = vmatmul.mubr.msk.bf16.vlgmr.msra.gmra.mxu0 %vm369_vm3, %v2290_v63  ;;  %3534 = vmatmul.mubr.msk.bf16.vlgmr.msra.gmra.mxu1 %vm369_vm3, %v2290_v63 }
 0x4b3   :  { %2390 = vmatpush1.bf16.msra.mxu0 %v3525_v3  ;;  %2407 = vmatprep.mubr.bf16.mxu0 %v3961_v1  ;;  %v3904_v3 = vld [vmem:[%s5125_s6 + $0xa8] sm:$0xff]  }
 0x4b4   :  { %2430 = vmatprep.subr.bf16.mxu0 %v3528_v0  ;;  %3732 = vmatpush3.bf16.msra.mxu1 %v3896_v4 }
 0x4b5   :  { %3733 = vmatprep.subr.bf16.mxu1 %v3898_v6 }
 0x4b8   :  { %3734 = vmatpush3.bf16.msra.mxu1 %v3900_v7 }
 0x4b9   :  { %3735 = vmatprep.subr.bf16.mxu1 %v3902_v8 }
 0x4ba   :  { %3532 = vmatmul.mubr.msk.bf16.vlgmr.msra.gmra.mxu0 %vm369_vm3, %v2290_v63 }
 0x4bb   :  { %2431 = vmatpush1.bf16.msra.mxu0 %v3527_v9  ;;  %2448 = vmatprep.mubr.bf16.mxu0 %v3961_v1  ;;  %v3893_v1 = vld [vmem:[%s5125_s6 + $0x68] sm:$0xff]  }
 0x4bc   :  { %3709 = vmatprep.subr.bf16.mxu0 %v3889_v10  ;;  %3736 = vmatpush3.bf16.msra.mxu1 %v3904_v3 }
 0x4bd   :  { %3737 = vmatprep.subr.bf16.mxu1 %v3906_v30 }
 0x4c0   :  { %3738 = vmatpush3.bf16.msra.mxu1 %v3908_v33 }
 0x4c1   :  { %3739 = vmatprep.subr.bf16.mxu1 %v3910_v35 }
 0x4c2   :  { %3533 = vmatmul.mubr.msk.bf16.vlgmr.msra.gmra.mxu0 %vm369_vm3, %v2290_v63 }
 0x4c3   :  { %3710 = vmatpush3.bf16.msra.mxu0 %v3890_v11 }
 0x4c4   :  { %3711 = vmatprep.subr.bf16.mxu0 %v3891_v13  ;;  %3740 = vmatpush3.bf16.msra.mxu1 %v3912_v39 }
 0x4c5   :  { %3741 = vmatprep.subr.bf16.mxu1 %v3914_v43 }
 0x4c7   :  { %3712 = vmatpush3.bf16.msra.mxu0 %v3892_v14 }
 0x4c8   :  { %3713 = vmatprep.subr.bf16.mxu0 %v3893_v1  ;;  %3742 = vmatpush3.bf16.msra.mxu1 %v3916_v46 }
 0x4c9   :  { %3743 = vmatprep.subr.bf16.mxu1 %v3917_v47 }
 0x4cb   :  { %3714 = vmatpush3.bf16.msra.mxu0 %v3895_v32 }
 0x4cc   :  { %3715 = vmatprep.subr.bf16.mxu0 %v3897_v17  ;;  %3744 = vmatpush3.bf16.msra.mxu1 %v3919_v41 }
 0x4cd   :  { %3745 = vmatprep.subr.bf16.mxu1 %v3921_v51  ;;  %v3924_v51 = vld [vmem:[%s5125_s6 + $0x130] sm:$0xff]  }
 0x4cf   :  { %3716 = vmatpush3.bf16.msra.mxu0 %v3899_v25 }
 0x4d0   :  { %3717 = vmatprep.subr.bf16.mxu0 %v3901_v27  ;;  %3746 = vmatpush3.bf16.msra.mxu1 %v3923_v54 }
 0x4d1   :  { %3775 = vmatprep.subr.bf16.mxu1 %v3926_v55 }
 0x4d3   :  { %3718 = vmatpush3.bf16.msra.mxu0 %v3903_v28 }
 0x4d4   :  { %3719 = vmatprep.subr.bf16.mxu0 %v3905_v29 }
 0x4d7   :  { %3720 = vmatpush3.bf16.msra.mxu0 %v3907_v31 }
 0x4d8   :  { %3721 = vmatprep.subr.bf16.mxu0 %v3909_v40 }
 0x4db   :  { %3722 = vmatpush3.bf16.msra.mxu0 %v3911_v45 }
 0x4dc   :  { %3723 = vmatprep.subr.bf16.mxu0 %v3913_v42  ;;  %v3922_v42 = vld [vmem:[%s5125_s6 + $0x170] sm:$0xff]  }
 0x4df   :  { %3724 = vmatpush3.bf16.msra.mxu0 %v3915_v44 }
 0x4e0   :  { %3753 = vmatprep.subr.bf16.mxu0 %v3918_v48 }
 0x572   :  { %v2368_v56 = vpop.f32.mrf.mxu0  ;;  %v4984_v57 = vpop.f32.mrf.mxu1 }
 0x573   :  { %v2501_v58 = vrot.slane %v2368_v56, %v4071_v24  ;;  %v2549_v19 = vrot.slane %v2368_v56, %v4077_v26  ;;  %v3925_v56 = vld [vmem:[%s5125_s6 + $0x168] sm:$0xff]  }
 0x574   :  { %v2370_v59 = vpop.f32.mrf.mxu0  ;;  %v2493_v60 = vpop.f32.mrf.mxu1 }
 0x575   :  { %v2530_v61 = vmul.f32 %v2501_v58, %v4650_v36  ;;  %v2538_v18 = vmul.f32 %v2501_v58, %v4665_v49  ;;  %v2505_v21 = vrot.slane %v2370_v59, %v4071_v24  ;;  %v2553_v8 = vrot.slane %v2370_v59, %v4077_v26 }
 0x576   :  { %v2372_v62 = vpop.f32.mrf.mxu0  ;;  %v2495_v63 = vpop.f32.mrf.mxu1  ;;  %v2529_v9 = vrot.slane %v2493_v60, %v4071_v24  ;;  %v2577_v33 = vrot.slane %v2493_v60, %v4077_v26 }
 0x577   :  { %v2578_v0 = vadd.f32 %v2549_v19, %v2530_v61  ;;  %v2586_v4 = vadd.f32 %v2549_v19, %v2538_v18  ;;  %v2531_v6 = vmul.f32 %v2505_v21, %v4656_v37  ;;  %v2539_v7 = vmul.f32 %v2505_v21, %v4673_v52  ;;  %v3927_v21 = vld [vmem:[%s5125_s6 + $0x128] sm:$0xff]   ;;  %v3928_v62 = vld [vmem:[%s5125_s6 + $0x1b8] sm:$0xff]  }
 0x578   :  { %v2373_v10 = vpop.f32.mrf.mxu0  ;;  %v2496_v36 = vpop.f32.mrf.mxu1  ;;  %v2537_v25 = vmul.f32 %v2529_v9, %v4805_v12  ;;  %v2545_v37 = vmul.f32 %v2529_v9, %v4821_v22  ;;  %v3920_v12 = vld [vmem:[%s5125_s6 + $0x138] sm:$0xff]   ;;  %v3930_v9 = vld [vmem:[%s5125_s6 + $0x1f0] sm:$0xff]  }
 0x579   :  { %v2594_v3 = vmax.f32 %v2578_v0, 0.0  ;;  %v2602_v49 = vmax.f32 %v2586_v4, 0.0  ;;  %v2579_v11 = vadd.f32 %v2553_v8, %v2531_v6  ;;  %v2587_v13 = vadd.f32 %v2553_v8, %v2539_v7  ;;  %v3929_v7 = vld [vmem:[%s5125_s6 + $0x160] sm:$0xff]  }
 0x57a   :  { %v2409_v14 = vpop.f32.mrf.mxu0  ;;  %v2585_v44 = vadd.f32 %v2577_v33, %v2537_v25  ;;  %v2593_v46 = vadd.f32 %v2577_v33, %v2545_v37  ;;  %v3937_v37 = vld [vmem:[%s5125_s6 + $0x150] sm:$0xff]   ;;  %v3942_v33 = vld [vmem:[%s5125_s6 + $0x1d8] sm:$0xff]  }
 0x57b   :  { %v2509_v1 = vrot.slane %v2409_v14, %v4071_v24  ;;  %v2595_v32 = vmax.f32 %v2579_v11, 0.0  ;;  %v2603_v17 = vmax.f32 %v2587_v13, 0.0  ;;  %v2557_v29 = vrot.slane %v2409_v14, %v4077_v26  ;;  %v3933_v13 = vld [vmem:[%s5125_s6 + $0x158] sm:$0xff]   ;;  %v3934_v14 = vld [vmem:[%s5125_s6 + $0x1e8] sm:$0xff]  }
 0x57c   :  { %v2411_v52 = vpop.f32.mrf.mxu0  ;;  %v2610_v31 = vpack.c.bf16 %v2602_v49, %v2594_v3  ;;  %v2601_v59 = vmax.f32 %v2585_v44, 0.0  ;;  %v2609_v60 = vmax.f32 %v2593_v46, 0.0  ;;  %v3949_v46 = vld [vmem:[%s5125_s6 + $0x1c8] sm:$0xff]  }
 0x57d   :  { %v2532_v27 = vmul.f32 %v2509_v1, %v4653_v34  ;;  %v2540_v28 = vmul.f32 %v2509_v1, %v4667_v50  ;;  %v2513_v30 = vrot.slane %v2411_v52, %v4071_v24  ;;  %v2561_v40 = vrot.slane %v2411_v52, %v4077_v26  ;;  %v3938_v52 = vld [vmem:[%s5125_s6 + $0x1e0] sm:$0xff]  }
 0x57e   :  { %v2413_v35 = vpop.f32.mrf.mxu0  ;;  %v2611_v45 = vpack.c.bf16 %v2603_v17, %v2595_v32  ;;  %v2617_v3 = vpack.c.bf16 %v2609_v60, %v2601_v59  ;;  %v3935_v32 = vld [vmem:[%s5125_s6 + $0x118] sm:$0xff]   ;;  %v3936_v17 = vld [vmem:[%s5125_s6 + $0x1a8] sm:$0xff]  }
 0x57f   :  { %v2580_v22 = vadd.f32 %v2557_v29, %v2532_v27  ;;  %v2588_v39 = vadd.f32 %v2557_v29, %v2540_v28  ;;  %v2533_v34 = vmul.f32 %v2513_v30, %v4659_v38  ;;  %v2541_v50 = vmul.f32 %v2513_v30, %v4675_v53  ;;  %v3939_v27 = vld [vmem:[%s5125_s6 + $0x110] sm:$0xff]   ;;  %v3940_v28 = vld [vmem:[%s5125_s6 + $0x1a0] sm:$0xff]  }
 0x580   :  { %3163 = vmatprep.mubr.bf16.mxu0 %v2611_v45  ;;  %v2414_v43 = vpop.f32.mrf.mxu0  ;;  %v2525_v35 = vrot.slane %v4984_v57, %v4071_v24 }
 0x581   :  { %v2581_v47 = vadd.f32 %v2561_v40, %v2533_v34  ;;  %v2589_v48 = vadd.f32 %v2561_v40, %v2541_v50  ;;  %3164 = vmatmul.mubr.bf16.vlgmr.msra.gmra.mxu0 %v2610_v31  ;;  %v2596_v38 = vmax.f32 %v2580_v22, 0.0  ;;  %v2604_v54 = vmax.f32 %v2588_v39, 0.0  ;;  %v3941_v31 = vld [vmem:[%s5125_s6 + $0x148] sm:$0xff]   ;;  %v3945_v22 = vld [vmem:[%s5125_s6 + $0x140] sm:$0xff]   ;;  %v3946_v39 = vld [vmem:[%s5125_s6 + $0x1d0] sm:$0xff]  }
 0x582   :  { %3754 = vmatpush3.bf16.msra.mxu0 %v3920_v12  ;;  %v2450_v41 = vpop.f32.mrf.mxu0  ;;  %v3947_v34 = vld [vmem:[%s5125_s6 + $0x100] sm:$0xff]   ;;  %v2536_v50 = vmul.f32 %v2525_v35, %v4799_v2 }
 0x583   :  { %v2597_v53 = vmax.f32 %v2581_v47, 0.0  ;;  %v2605_v55 = vmax.f32 %v2589_v48, 0.0  ;;  %3755 = vmatprep.subr.bf16.mxu0 %v3922_v42  ;;  %v2612_v63 = vpack.c.bf16 %v2604_v54, %v2596_v38  ;;  %v2517_v25 = vrot.slane %v2450_v41, %v4071_v24  ;;  %v3950_v48 = vld [vmem:[%s5125_s6 + $0x188] sm:$0xff]  }
 0x584   :  { %v2452_v58 = vpop.f32.mrf.mxu0  ;;  %v2565_v40 = vrot.slane %v2450_v41, %v4077_v26  ;;  %v2544_v42 = vmul.f32 %v2525_v35, %v4813_v16  ;;  %v2573_v47 = vrot.slane %v4984_v57, %v4077_v26 }
 0x585   :  { %v2521_v61 = vrot.slane %v2452_v58, %v4071_v24  ;;  %v2613_v19 = vpack.c.bf16 %v2605_v55, %v2597_v53  ;;  %v2569_v6 = vrot.slane %v2452_v58, %v4077_v26  ;;  %v2534_v29 = vmul.f32 %v2517_v25, %v4796_v23  ;;  %v3943_v23 = vld [vmem:[%s5125_s6 + $0x108] sm:$0xff]   ;;  %v3948_v24 = vld [vmem:[%s5125_s6 + $0x190] sm:$0xff]   ;;  %v3952_v26 = vld [vmem:[%s5125_s6 + $0x180] sm:$0xff]  }
 0x586   :  { %3756 = vmatpush3.bf16.msra.mxu0 %v3924_v51  ;;  %v2454_v18 = vpop.f32.mrf.mxu0  ;;  %v2542_v30 = vmul.f32 %v2517_v25, %v4811_v15  ;;  %v3944_v15 = vld [vmem:[%s5125_s6 + $0x198] sm:$0xff]   ;;  %v2584_v2 = vadd.f32 %v2573_v47, %v2536_v50  ;;  %v2592_v41 = vadd.f32 %v2573_v47, %v2544_v42  ;;  %v3951_v51 = vld [vmem:[%s5125_s6 + $0x1c0] sm:$0xff]  }
 0x587   :  { %v2535_v0 = vmul.f32 %v2521_v61, %v4802_v5  ;;  %v2543_v4 = vmul.f32 %v2521_v61, %v4819_v20  ;;  %3757 = vmatprep.subr.bf16.mxu0 %v3925_v56  ;;  %3204 = vmatprep.mubr.bf16.mxu1 %v2613_v19  ;;  %v3931_v5 = vld [vmem:[%s5125_s6 + $0x120] sm:$0xff]   ;;  %v3932_v20 = vld [vmem:[%s5125_s6 + $0x1b0] sm:$0xff]   ;;  %v2582_v45 = vadd.f32 %v2565_v40, %v2534_v29 }
 0x588   :  { %v2455_v8 = vpop.f32.mrf.mxu0  ;;  %3205 = vmatmul.mubr.bf16.vlgmr.msra.gmra.mxu1 %v2612_v63  ;;  %v2590_v12 = vadd.f32 %v2565_v40, %v2542_v30  ;;  %v2600_v57 = vmax.f32 %v2584_v2, 0.0  ;;  %v2608_v38 = vmax.f32 %v2592_v41, 0.0 }
 0x589   :  { %v2583_v10 = vadd.f32 %v2569_v6, %v2535_v0  ;;  %v2591_v36 = vadd.f32 %v2569_v6, %v2543_v4  ;;  %3776 = vmatpush3.bf16.msra.mxu1 %v3928_v62  ;;  %3286 = vmatprep.mubr.bf16.mxu1 %v2617_v3  ;;  %v2598_v43 = vmax.f32 %v2582_v45, 0.0  ;;  %v2618_v62 = vld [vmem:[%s5122_s1 + $0x6] ss:$0 sm:$0xff] }
 0x58a   :  { %3758 = vmatpush3.bf16.msra.mxu0 %v3927_v21  ;;  %3777 = vmatprep.subr.bf16.mxu1 %v3930_v9  ;;  %v2606_v44 = vmax.f32 %v2590_v12, 0.0  ;;  %v2616_v54 = vpack.c.bf16 %v2608_v38, %v2600_v57 }
 0x58b   :  { %v2599_v49 = vmax.f32 %v2583_v10, 0.0  ;;  %v2607_v11 = vmax.f32 %v2591_v36, 0.0  ;;  %3759 = vmatprep.subr.bf16.mxu0 %v3929_v7 }
 0x58c   :  { %v2614_v16 = vpack.c.bf16 %v2606_v44, %v2598_v43 }
 0x58d   :  { %v2615_v1 = vpack.c.bf16 %v2607_v11, %v2599_v49  ;;  %3778 = vmatpush3.bf16.msra.mxu1 %v3932_v20 }
 0x58e   :  { %3760 = vmatpush3.bf16.msra.mxu0 %v3931_v5  ;;  %3779 = vmatprep.subr.bf16.mxu1 %v3934_v14 }
 0x58f   :  { %3761 = vmatprep.subr.bf16.mxu0 %v3933_v13  ;;  %3245 = vmatprep.mubr.bf16.mxu0 %v2615_v1 }
 0x591   :  { %3780 = vmatpush3.bf16.msra.mxu1 %v3936_v17 }
 0x592   :  { %3762 = vmatpush3.bf16.msra.mxu0 %v3935_v32  ;;  %3781 = vmatprep.subr.bf16.mxu1 %v3938_v52 }
 0x593   :  { %3763 = vmatprep.subr.bf16.mxu0 %v3937_v37 }
 0x595   :  { %3782 = vmatpush3.bf16.msra.mxu1 %v3940_v28 }
 0x596   :  { %3764 = vmatpush3.bf16.msra.mxu0 %v3939_v27  ;;  %3783 = vmatprep.subr.bf16.mxu1 %v3942_v33 }
 0x597   :  { %3765 = vmatprep.subr.bf16.mxu0 %v3941_v31 }
 0x599   :  { %3784 = vmatpush3.bf16.msra.mxu1 %v3944_v15 }
 0x59a   :  { %3766 = vmatpush3.bf16.msra.mxu0 %v3943_v23  ;;  %3785 = vmatprep.subr.bf16.mxu1 %v3946_v39 }
 0x59b   :  { %3767 = vmatprep.subr.bf16.mxu0 %v3945_v22 }
 0x59d   :  { %3786 = vmatpush3.bf16.msra.mxu1 %v3948_v24 }
 0x59e   :  { %3768 = vmatpush3.bf16.msra.mxu0 %v3947_v34  ;;  %3787 = vmatprep.subr.bf16.mxu1 %v3949_v46 }
 0x5a1   :  { %3246 = vmatmul.mubr.bf16.vlgmr.msra.gmra.mxu0 %v2614_v16  ;;  %3788 = vmatpush3.bf16.msra.mxu1 %v3950_v48 }
 0x5a2   :  { %3789 = vmatprep.subr.bf16.mxu1 %v3951_v51 }
 0x5a5   :  { %3790 = vmatpush3.bf16.msra.mxu1 %v3952_v26 }
 0x5a8   :  { %3287 = vmatmul.mubr.bf16.vlgmr.msra.gmra.mxu1 %v2616_v54 }
 0x641   :  { %v3725_v53 = vpop.f32.mrf.mxu0 }
 0x643   :  { %v3726_v55 = vpop.f32.mrf.mxu0 }
 0x644   :  { %v3727_v21 = vadd.f32 %v3726_v55, %v3725_v53 }
 0x645   :  { %v3728_v56 = vpop.f32.mrf.mxu0 }
 0x646   :  { %v3166_v6 = vadd.f32 %v3727_v21, %v2618_v62 }
 0x647   :  { %v3729_v59 = vpop.f32.mrf.mxu0 }
 0x648   :  { %v3747_v58 = vpop.f32.mrf.mxu1  ;;  %v3730_v7 = vadd.f32 %v3729_v59, %v3728_v56 }
 0x64a   :  { %v3748_v60 = vpop.f32.mrf.mxu1  ;;  %v3169_v20 = vadd.f32 %v3730_v7, %v2618_v62 }
 0x64b   :  { %v3749_v0 = vadd.f32 %v3748_v60, %v3747_v58 }
 0x64c   :  { %v3750_v18 = vpop.f32.mrf.mxu1 }
 0x64d   :  { %v3207_v36 = vadd.f32 %v3749_v0, %v3166_v6 }
 0x64e   :  { %v3751_v4 = vpop.f32.mrf.mxu1 }
 0x64f   :  { %v3752_v3 = vadd.f32 %v3751_v4, %v3750_v18 }
 0x651   :  { %v3210_v1 = vadd.f32 %v3752_v3, %v3169_v20 }
 0x661   :  { %v3769_v61 = vpop.f32.mrf.mxu0 }
 0x663   :  { %v3770_v19 = vpop.f32.mrf.mxu0 }
 0x664   :  { %v3771_v8 = vadd.f32 %v3770_v19, %v3769_v61 }
 0x665   :  { %v3772_v63 = vpop.f32.mrf.mxu0 }
 0x666   :  { %v3248_v49 = vadd.f32 %v3771_v8, %v3207_v36 }
 0x667   :  { %v3773_v9 = vpop.f32.mrf.mxu0 }
 0x668   :  { %v3791_v10 = vpop.f32.mrf.mxu1  ;;  %v3774_v11 = vadd.f32 %v3773_v9, %v3772_v63 }
 0x66a   :  { %v3792_v5 = vpop.f32.mrf.mxu1  ;;  %v3251_v25 = vadd.f32 %v3774_v11, %v3210_v1 }
 0x66b   :  { %v3793_v13 = vadd.f32 %v3792_v5, %v3791_v10 }
 0x66c   :  { %v3794_v14 = vpop.f32.mrf.mxu1 }
 0x66d   :  { %v3289_v32 = vadd.f32 %v3793_v13, %v3248_v49 }
 0x66e   :  { %v3795_v17 = vpop.f32.mrf.mxu1 }
 0x66f   :  { %3957 = vtanh.f32 %v3289_v32  ;;  %v3796_v37 = vadd.f32 %v3795_v17, %v3794_v14 }
 0x671   :  { %v3292_v52 = vadd.f32 %v3796_v37, %v3251_v25 }
 0x673   :  { %3959 = vtanh.f32 %v3292_v52 }
 0x67c   :  { %v3958_v27 = vpop.eup %3957 }
 0x67d   :  { %3297 = vst [vmem:[%s5126_s7] sm:$0xff] %v3958_v27 }
 0x680   :  { %v3960_v28 = vpop.eup %3959 }
 0x681   :  { %3298 = vst [vmem:[%s5126_s7 + $0x8] sm:$0xff] %v3960_v28 }

</bundles_post_ra>
